<compile_context>
chip_gen: v7x
topology: tpu7x:2x2x1
jax: 0.10.0
libtpu: 0.0.40
codegen_flags: <defaults>
</compile_context>

<pallas_src>
import functools

import jax
import jax.numpy as jnp
from jax import lax
from jax.experimental import pallas as pl
from jax.experimental.pallas import tpu as pltpu

_NEG_FILL = -1.0e30  # finite "minus infinity" for masked similarities


def _round_up(x, m):
    return ((x + m - 1) // m) * m


def _tpu_vmem_capacity_bytes():
    """Best-effort per-core VMEM capacity (generation aware)."""
    try:
        info = pltpu.get_tpu_info()
        cap = getattr(info, "vmem_capacity_bytes", None)
        if cap:
            return int(cap)
    except Exception:
        pass
    try:
        kind = jax.devices()[0].device_kind.lower()
    except Exception:
        kind = ""
    if "v2" in kind or "v3" in kind:
        return 16 * 1024 * 1024
    if "v4" in kind or "v5" in kind or "v6" in kind:
        return 128 * 1024 * 1024
    return 64 * 1024 * 1024  # v7x (64 MiB/TC) and unknown: conservative


def _fold_add(x, tk):
    """(TQ, TK) -> (TQ, 128): sum the TK/128 lane groups (pure VPU adds)."""
    acc = x[:, 0:128]
    for g in range(1, tk // 128):
        acc = acc + x[:, g * 128:(g + 1) * 128]
    return acc


def _fold_max(x, tk):
    """(TQ, TK) -> (TQ, 128): per-lane max over the TK/128 lane groups."""
    acc = x[:, 0:128]
    for g in range(1, tk // 128):
        acc = jnp.maximum(acc, x[:, g * 128:(g + 1) * 128])
    return acc


def _online_update(sim, sim_e, pos_f, out_ref, m_scr, l_scr, s_scr, p_scr, *,
                   tk, inv_t, loss_scale, assume_normalized):
    """Online LSE / masked-sum update for one (TQ, TK) similarity tile.

    All running state lives in lane-wise (TQ, 128) f32 scratch; the single
    cross-lane reduction happens only on the last column tile.
    """
    j = pl.program_id(1)
    n_groups = tk // 128

    @pl.when(j == 0)
    def _():
        if not assume_normalized:
            m_scr[...] = jnp.full(m_scr.shape, _NEG_FILL, dtype=m_scr.dtype)
        l_scr[...] = jnp.zeros_like(l_scr)
        s_scr[...] = jnp.zeros_like(s_scr)
        p_scr[...] = jnp.zeros_like(p_scr)

    if assume_normalized:
        # sim <= 1/temperature statically (L2-normalized features, scale folded
        # into the anchors) -> fixed max, no online-max bookkeeping.
        p_sum = None
        for g in range(n_groups):
            e = jnp.exp(sim_e[:, g * 128:(g + 1) * 128] - inv_t)
            p_sum = e if p_sum is None else p_sum + e
        l_scr[...] = l_scr[...] + p_sum
    else:
        tile_max = _fold_max(sim_e, tk)                     # (TQ, 128), VPU only
        m_prev = m_scr[...]
        m_new = jnp.maximum(m_prev, tile_max)
        alpha = jnp.exp(m_prev - m_new)
        p_sum = None
        for g in range(n_groups):
            e = jnp.exp(sim_e[:, g * 128:(g + 1) * 128] - m_new)
            p_sum = e if p_sum is None else p_sum + e
        l_scr[...] = alpha * l_scr[...] + p_sum
        m_scr[...] = m_new

    # positive path: sum(mask*sim) and sum(mask); log_prob eliminated
    # algebraically: sum(mask*log_prob) = sum(mask*sim) - sum(mask)*LSE.
    s_scr[...] = s_scr[...] + _fold_add(pos_f * sim, tk)
    p_scr[...] = p_scr[...] + _fold_add(pos_f, tk)

    @pl.when(j == pl.num_programs(1) - 1)
    def _():
        if assume_normalized:
            l_row = jnp.sum(l_scr[...], axis=1, keepdims=True)
            lse = inv_t + jnp.log(l_row)
        else:
            m = m_scr[...]
            row_max = jnp.max(m, axis=1, keepdims=True)             # one XLU max
            l_row = jnp.sum(l_scr[...] * jnp.exp(m - row_max),
                            axis=1, keepdims=True)                  # one XLU sum
            lse = row_max + jnp.log(l_row)
        s_row = jnp.sum(s_scr[...], axis=1, keepdims=True)
        p_row = jnp.sum(p_scr[...], axis=1, keepdims=True)
        # Exact division (no approx reciprocal).  Anchors with zero positives
        # divide by zero -> nan, matching the PyTorch reference failure mode.
        out_ref[...] = loss_scale * (s_row / p_row - lse)           # (TQ, 1)


def _sim_and_kill(feat_a_ref, feat_c_ref, *, tq, tk, n_valid, has_pad, resident):
    """Compute the (TQ, TK) similarity tile and the kill (exclusion) mask."""
    i = pl.program_id(0)
    j = pl.program_id(1)

    if resident:
        col0 = pl.multiple_of(j * tk, tk)
        feat_c = feat_c_ref[pl.ds(col0, tk), :]       # slice resident contrast
    else:
        feat_c = feat_c_ref[...]                      # streamed (TK, D) tile

    # A . C^T, contracting the last dim of both operands (flash-attn pattern,
    # lowers to a plain MXU matmul without an in-kernel transpose).
    sim = lax.dot_general(feat_a_ref[...], feat_c,
                          (((1,), (1,)), ((), ())),
                          preferred_element_type=jnp.float32)       # (TQ, TK)

    row_ids = i * tq + lax.broadcasted_iota(jnp.int32, (tq, tk), 0)
    col_ids = j * tk + lax.broadcasted_iota(jnp.int32, (tq, tk), 1)
    kill = row_ids == col_ids                          # self-contrast diagonal
    if has_pad:                                        # static: N was padded
        kill = jnp.logical_or(kill, col_ids >= n_valid)
    return sim, kill


def _supcon_label_kernel(lab_r_ref, lab_c_ref, feat_a_ref, feat_c_ref, out_ref,
                         m_scr, l_scr, s_scr, p_scr, *,
                         tq, tk, n_valid, has_pad, resident,
                         inv_t, loss_scale, assume_normalized):
    sim, kill = _sim_and_kill(feat_a_ref, feat_c_ref, tq=tq, tk=tk,
                              n_valid=n_valid, has_pad=has_pad,
                              resident=resident)
    pos_f = jnp.logical_and(lab_r_ref[...] == lab_c_ref[...],
                            jnp.logical_not(kill)).astype(jnp.float32)
    sim_e = jnp.where(kill, _NEG_FILL, sim)
    _online_update(sim, sim_e, pos_f, out_ref, m_scr, l_scr, s_scr, p_scr,
                   tk=tk, inv_t=inv_t, loss_scale=loss_scale,
                   assume_normalized=assume_normalized)


def _supcon_mask_kernel(mask_ref, feat_a_ref, feat_c_ref, out_ref,
                        m_scr, l_scr, s_scr, p_scr, *,
                        tq, tk, n_valid, has_pad, resident,
                        inv_t, loss_scale, assume_normalized):
    # Fallback path for a user-supplied (possibly asymmetric) contrastive mask.
    sim, kill = _sim_and_kill(feat_a_ref, feat_c_ref, tq=tq, tk=tk,
                              n_valid=n_valid, has_pad=has_pad,
                              resident=resident)
    pos_f = jnp.where(kill, 0.0, mask_ref[...].astype(jnp.float32))
    sim_e = jnp.where(kill, _NEG_FILL, sim)
    _online_update(sim, sim_e, pos_f, out_ref, m_scr, l_scr, s_scr, p_scr,
                   tk=tk, inv_t=inv_t, loss_scale=loss_scale,
                   assume_normalized=assume_normalized)


def supcon_loss(features, labels=None, mask=None, *, temperature=0.07,
                contrast_mode='all', base_temperature=0.07,
                matmul_dtype=jnp.bfloat16, assume_normalized=False):
    """Pallas-backed SupConLoss.forward (matches the PyTorch reference).

    matmul_dtype=bf16 (default) trades ~1e-2-level loss error for MXU speed;
    pass jnp.float32 for tighter numerics.  assume_normalized=True is only
    valid when features are L2-normalized along the last dim.
    """
    features = jnp.asarray(features)
    if features.ndim < 3:
        raise ValueError('`features` needs to be [bsz, n_views, ...]')
    if features.ndim > 3:
        features = features.reshape(features.shape[0], features.shape[1], -1)
    bsz, n_views, dim = features.shape

    if labels is not None and mask is not None:
        raise ValueError('Cannot define both `labels` and `mask`')

    if contrast_mode == 'one':
        n_anchor, anchor_count = bsz, 1
    elif contrast_mode == 'all':
        n_anchor, anchor_count = n_views * bsz, n_views
    else:
        raise ValueError('Unknown mode: {}'.format(contrast_mode))
    n_contrast = n_views * bsz

    # contrast_feature = cat(unbind(features, 1), 0): row v*bsz + b = features[b, v]
    contrast_feature = jnp.transpose(features, (1, 0, 2)).reshape(
        n_contrast, dim).astype(jnp.float32)
    # anchor rows are a prefix of the contrast rows for both modes.
    anchor_feature = contrast_feature[:n_anchor]

    # --- tiling: raise TQ with batch size but keep >= 2 row tiles (megacore) ---
    if n_anchor >= 1024:
        TQ = 512
    elif n_anchor >= 512:
        TQ = 256
    else:
        TQ = 128
    TK = 256                                   # full MXU width on v6e/v7x
    A_pad = _round_up(n_anchor, TQ)
    N_pad = _round_up(n_contrast, TK)
    D_pad = _round_up(dim, 128)
    has_pad = N_pad != n_contrast

    inv_t = 1.0 / float(temperature)
    loss_scale = -(float(temperature) / float(base_temperature))

    # --- generation-aware VMEM budget & resident-contrast decision ---
    itemsize = jnp.dtype(matmul_dtype).itemsize
    vmem_budget = int(_tpu_vmem_capacity_bytes() * 3 // 4)
    tile_temp_bytes = 8 * TQ * TK * 4          # in-kernel (TQ, TK) temporaries
    fixed_bytes = (2 * TQ * D_pad * itemsize   # feat_a (double-buffered)
                   + 4 * TQ * 128 * 4          # lane-wise accumulators
                   + 2 * TQ * 4                # per-anchor output block
                   + 2 * (TQ + TK) * 4         # label tiles
                   + tile_temp_bytes
                   + (8 << 20))                # compiler / pipeline headroom
    if mask is not None:
        fixed_bytes += 2 * TQ * TK * 2         # bf16 mask tiles (double-buffered)
    resident = (fixed_bytes + 2 * N_pad * D_pad * itemsize) <= vmem_budget

    # zero-pad D (inner products unaffected) and rows/cols (killed / discarded);
    # fold 1/temperature into the anchor operand; cast to the MXU input dtype.
    feat_c = jnp.pad(contrast_feature,
                     ((0, N_pad - n_contrast), (0, D_pad - dim))).astype(matmul_dtype)
    feat_a = jnp.pad(anchor_feature * inv_t,
                     ((0, A_pad - n_anchor), (0, D_pad - dim))).astype(matmul_dtype)

    grid = (A_pad // TQ, N_pad // TK)
    feat_a_spec = pl.BlockSpec((TQ, D_pad), lambda i, j: (i, 0))
    if resident:
        # whole contrast matrix lives in VMEM; fetched once per core, sliced
        # per column tile with pl.ds inside the kernel.
        feat_c_spec = pl.BlockSpec((N_pad, D_pad), lambda i, j: (0, 0))
    else:
        feat_c_spec = pl.BlockSpec((TK, D_pad), lambda i, j: (j, 0))
    out_spec = pl.BlockSpec((TQ, 1), lambda i, j: (i, 0))
    out_shape = jax.ShapeDtypeStruct((A_pad, 1), jnp.float32)
    scratch = [pltpu.VMEM((TQ, 128), jnp.float32)] * 4
    cparams = pltpu.CompilerParams(
        dimension_semantics=("parallel", "arbitrary"),
        vmem_limit_bytes=vmem_budget)

    common = dict(tq=TQ, tk=TK, n_valid=n_contrast, has_pad=has_pad,
                  resident=resident, inv_t=inv_t, loss_scale=loss_scale,
                  assume_normalized=assume_normalized)

    if mask is None:
        # labels path (SimCLR degenerate case == labels = arange(bsz)).
        if labels is None:
            lab = jnp.arange(bsz, dtype=jnp.int32)
        else:
            lab = jnp.asarray(labels).reshape(-1).astype(jnp.int32)
            if lab.shape[0] != bsz:
                raise ValueError('Num of labels does not match num of features')
        lab_full = jnp.tile(lab, n_views)                              # (N,)
        lab_col = jnp.pad(lab_full, (0, N_pad - n_contrast)).reshape(1, N_pad)
        lab_row = jnp.pad(lab_full[:n_anchor],
                          (0, A_pad - n_anchor)).reshape(A_pad, 1)

        kernel = functools.partial(_supcon_label_kernel, **common)
        per_anchor = pl.pallas_call(
            kernel,
            out_shape=out_shape,
            grid=grid,
            in_specs=[pl.BlockSpec((TQ, 1), lambda i, j: (i, 0)),
                      pl.BlockSpec((1, TK), lambda i, j: (0, j)),
                      feat_a_spec, feat_c_spec],
            out_specs=out_spec,
            scratch_shapes=scratch,
            compiler_params=cparams,
        )(lab_row, lab_col, feat_a, feat_c)
    else:
        # explicit user mask: stream (TQ, TK) tiles of the tiled mask in bf16
        # (0/1 masks are exact; arbitrary float masks lose sub-bf16 precision).
        base_mask = jnp.asarray(mask).astype(jnp.float32)
        tiled = jnp.tile(base_mask, (anchor_count, n_views))           # (n_anchor, N)
        tiled = jnp.pad(tiled, ((0, A_pad - n_anchor),
                                (0, N_pad - n_contrast))).astype(jnp.bfloat16)
        mask_spec = pl.BlockSpec((TQ, TK), lambda i, j: (i, j))

        kernel = functools.partial(_supcon_mask_kernel, **common)
        per_anchor = pl.pallas_call(
            kernel,
            out_shape=out_shape,
            grid=grid,
            in_specs=[mask_spec, feat_a_spec, feat_c_spec],
            out_specs=out_spec,
            scratch_shapes=scratch,
            compiler_params=cparams,
        )(tiled, feat_a, feat_c)

    # loss.view(anchor_count, batch_size).mean() == mean over the real anchors.
    return jnp.mean(per_anchor[:n_anchor, 0])


def _reference_supcon(features, labels=None, mask=None, temperature=0.07,
                      contrast_mode='all', base_temperature=0.07):
    """Pure-JAX reference mirroring the PyTorch module."""
    features = jnp.asarray(features, jnp.float32)
    if features.ndim > 3:
        features = features.reshape(features.shape[0], features.shape[1], -1)
    bsz, n_views = features.shape[0], features.shape[1]
    if labels is None and mask is None:
        mask = jnp.eye(bsz, dtype=jnp.float32)
    elif labels is not None:
        labels = jnp.asarray(labels).reshape(-1, 1)
        mask = (labels == labels.T).astype(jnp.float32)
    else:
        mask = jnp.asarray(mask, jnp.float32)
    contrast_feature = jnp.transpose(features, (1, 0, 2)).reshape(n_views * bsz, -1)
    if contrast_mode == 'one':
        anchor_feature, anchor_count = features[:, 0], 1
    else:
        anchor_feature, anchor_count = contrast_feature, n_views
    adc = jnp.matmul(anchor_feature, contrast_feature.T) / temperature
    logits = adc - jnp.max(adc, axis=1, keepdims=True)
    mask = jnp.tile(mask, (anchor_count, n_views))
    n_a = anchor_count * bsz
    logits_mask = jnp.ones_like(mask).at[jnp.arange(n_a), jnp.arange(n_a)].set(0.0)
    mask = mask * logits_mask
    exp_logits = jnp.exp(logits) * logits_mask
    log_prob = logits - jnp.log(exp_logits.sum(1, keepdims=True))
    mean_log_prob_pos = (mask * log_prob).sum(1) / mask.sum(1)
    loss = -(temperature / base_temperature) * mean_log_prob_pos
    return loss.reshape(anchor_count, bsz).mean()


if __name__ == "__main__":
    key = jax.random.PRNGKey(0)
    kf, kl = jax.random.split(key)

    bsz, n_views, dim = 8, 2, 32
    features = jax.random.normal(kf, (bsz, n_views, dim), dtype=jnp.float32)
    features = features / jnp.linalg.norm(features, axis=-1, keepdims=True)
    labels = jax.random.randint(kl, (bsz,), 0, 4, dtype=jnp.int32)

    checks = []

    # 1) labels path, f32 matmul -> checks the tiled / online-LSE math.
    ref_lab = _reference_supcon(features, labels=labels)
    got = supcon_loss(features, labels=labels, matmul_dtype=jnp.float32)
    checks.append(("labels/f32", got, ref_lab, 2e-2, 2e-2))

    # 2) labels path, default bf16 MXU matmul -> loose tolerance.
    got = supcon_loss(features, labels=labels)
    checks.append(("labels/bf16", got, ref_lab, 5e-2, 5e-2))

    # 3) fixed-max path (features are L2-normalized here).
    got = supcon_loss(features, labels=labels, matmul_dtype=jnp.float32,
                      assume_normalized=True)
    checks.append(("labels/f32/fixedmax", got, ref_lab, 2e-2, 2e-2))

    # 4) SimCLR degenerate case (labels=None, mask=None).
    got = supcon_loss(features, matmul_dtype=jnp.float32)
    ref = _reference_supcon(features)
    checks.append(("simclr/f32", got, ref, 2e-2, 2e-2))

    # 5) contrast_mode='one'.
    got = supcon_loss(features, labels=labels, contrast_mode='one',
                      matmul_dtype=jnp.float32)
    ref = _reference_supcon(features, labels=labels, contrast_mode='one')
    checks.append(("one/f32", got, ref, 2e-2, 2e-2))

    # 6) explicit-mask fallback kernel.
    user_mask = (labels[:, None] == labels[None, :]).astype(jnp.float32)
    got = supcon_loss(features, mask=user_mask, matmul_dtype=jnp.float32)
    ref = _reference_supcon(features, mask=user_mask)
    checks.append(("mask/f32", got, ref, 2e-2, 2e-2))

    for name, got, want, rtol, atol in checks:
        got = jax.block_until_ready(got)
        assert bool(jnp.isfinite(got)), (name, float(got))
        assert jnp.allclose(got, want, rtol=rtol, atol=atol), (
            name, float(got), float(want))

    print("KERNEL_OK")
</pallas_src>

<mosaic_0001>
module attributes {stable_mosaic.version = 11 : i64} {
  func.func @_supcon_label_kernel(%arg0: i32, %arg1: i32, %arg2: memref<128x1xi32, #tpu.memory_space<vmem>>, %arg3: memref<1x256xi32, #tpu.memory_space<vmem>>, %arg4: memref<128x128xf32, #tpu.memory_space<vmem>>, %arg5: memref<256x128xf32, #tpu.memory_space<vmem>>, %arg6: memref<128x1xf32, #tpu.memory_space<vmem>>, %arg7: memref<128x128xf32, #tpu.memory_space<vmem>>, %arg8: memref<128x128xf32, #tpu.memory_space<vmem>>, %arg9: memref<128x128xf32, #tpu.memory_space<vmem>>, %arg10: memref<128x128xf32, #tpu.memory_space<vmem>>) attributes {dimension_semantics = [#tpu.dimension_semantics<parallel>, #tpu.dimension_semantics<arbitrary>], iteration_bounds = array<i64: 1, 1>, scalar_prefetch = 0 : i64, scratch_operands = 4 : i64, tpu.core_type = #tpu.core_type<tc>, window_params = [{transform_indices = @transform_0, window_bounds = array<i64: 128, 1>}, {transform_indices = @transform_1, window_bounds = array<i64: 1, 256>}, {transform_indices = @transform_2, window_bounds = array<i64: 128, 128>}, {pipeline_mode = #tpu.pipeline_mode<synchronous>, transform_indices = @transform_3, window_bounds = array<i64: 256, 128>}, {transform_indices = @transform_4, window_bounds = array<i64: 128, 1>}]} {
    %c256_i32 = arith.constant 256 : i32
    %0 = arith.muli %arg1, %c256_i32 : i32
    %1 = tpu.assume_multiple %0, 256 : i32
    %2 = arith.index_cast %1 : i32 to index
    %c0 = arith.constant 0 : index
    %3 = vector.load %arg5[%2, %c0] : memref<256x128xf32, #tpu.memory_space<vmem>>, vector<256x128xf32>
    %c0_0 = arith.constant 0 : index
    %c0_1 = arith.constant 0 : index
    %4 = vector.load %arg4[%c0_0, %c0_1] : memref<128x128xf32, #tpu.memory_space<vmem>>, vector<128x128xf32>
    %cst = arith.constant dense<0.000000e+00> : vector<128x256xf32>
    %5 = tpu.matmul %4, %3, %cst {dimension_numbers = #tpu.dot_dimension_numbers<[1], [1], [0], [0], [0, 0, 1, 0], [], []>} : vector<128x128xf32>, vector<256x128xf32>, vector<128x256xf32> -> vector<128x256xf32>
    %c128_i32 = arith.constant 128 : i32
    %6 = arith.muli %arg0, %c128_i32 : i32
    %7 = tpu.iota {dimensions = array<i32: 0>} : vector<128x256xi32>
    %8 = vector.broadcast %6 : i32 to vector<128x256xi32>
    %9 = arith.addi %8, %7 : vector<128x256xi32>
    %c256_i32_2 = arith.constant 256 : i32
    %10 = arith.muli %arg1, %c256_i32_2 : i32
    %11 = tpu.iota {dimensions = array<i32: 1>} : vector<128x256xi32>
    %12 = vector.broadcast %10 : i32 to vector<128x256xi32>
    %13 = arith.addi %12, %11 : vector<128x256xi32>
    %14 = arith.cmpi eq, %9, %13 : vector<128x256xi32>
    %c16_i32 = arith.constant 16 : i32
    %15 = vector.broadcast %c16_i32 : i32 to vector<128x256xi32>
    %16 = arith.cmpi sge, %13, %15 : vector<128x256xi32>
    %17 = arith.ori %14, %16 : vector<128x256xi1>
    %c0_3 = arith.constant 0 : index
    %c0_4 = arith.constant 0 : index
    %18 = vector.load %arg2[%c0_3, %c0_4] : memref<128x1xi32, #tpu.memory_space<vmem>>, vector<128x1xi32>
    %c0_5 = arith.constant 0 : index
    %c0_6 = arith.constant 0 : index
    %19 = vector.load %arg3[%c0_5, %c0_6] : memref<1x256xi32, #tpu.memory_space<vmem>>, vector<1x256xi32>
    %20 = vector.broadcast %18 : vector<128x1xi32> to vector<128x256xi32>
    %21 = vector.broadcast %19 : vector<1x256xi32> to vector<128x256xi32>
    %22 = arith.cmpi eq, %20, %21 : vector<128x256xi32>
    %cst_7 = arith.constant dense<true> : vector<128x256xi1>
    %23 = arith.xori %17, %cst_7 : vector<128x256xi1>
    %24 = arith.andi %22, %23 : vector<128x256xi1>
    %25 = arith.extui %24 : vector<128x256xi1> to vector<128x256xi32>
    %26 = arith.sitofp %25 : vector<128x256xi32> to vector<128x256xf32>
    %cst_8 = arith.constant -1.000000e+30 : f32
    %27 = vector.broadcast %cst_8 : f32 to vector<128x256xf32>
    %28 = arith.select %17, %27, %5 : vector<128x256xi1>, vector<128x256xf32>
    %c0_i32 = arith.constant 0 : i32
    %29 = arith.cmpi eq, %arg1, %c0_i32 : i32
    %30 = arith.extui %29 : i1 to i32
    %c0_i32_9 = arith.constant 0 : i32
    %31 = arith.cmpi ne, %30, %c0_i32_9 : i32
    scf.if %31 {
      %cst_28 = arith.constant -1.000000e+30 : f32
      %67 = vector.broadcast %cst_28 : f32 to vector<128x128xf32>
      %c0_29 = arith.constant 0 : index
      %c0_30 = arith.constant 0 : index
      %68 = vector.load %arg7[%c0_29, %c0_30] : memref<128x128xf32, #tpu.memory_space<vmem>>, vector<128x128xf32>
      tpu.vector_store %arg7[%c0_29, %c0_30], %67 {strides = array<i32>} : memref<128x128xf32, #tpu.memory_space<vmem>>, vector<128x128xf32>,
      %cst_31 = arith.constant 0.000000e+00 : f32
      %69 = vector.broadcast %cst_31 : f32 to vector<128x128xf32>
      %c0_32 = arith.constant 0 : index
      %c0_33 = arith.constant 0 : index
      %70 = vector.load %arg8[%c0_32, %c0_33] : memref<128x128xf32, #tpu.memory_space<vmem>>, vector<128x128xf32>
      tpu.vector_store %arg8[%c0_32, %c0_33], %69 {strides = array<i32>} : memref<128x128xf32, #tpu.memory_space<vmem>>, vector<128x128xf32>,
      %cst_34 = arith.constant 0.000000e+00 : f32
      %71 = vector.broadcast %cst_34 : f32 to vector<128x128xf32>
      %c0_35 = arith.constant 0 : index
      %c0_36 = arith.constant 0 : index
      %72 = vector.load %arg9[%c0_35, %c0_36] : memref<128x128xf32, #tpu.memory_space<vmem>>, vector<128x128xf32>
      tpu.vector_store %arg9[%c0_35, %c0_36], %71 {strides = array<i32>} : memref<128x128xf32, #tpu.memory_space<vmem>>, vector<128x128xf32>,
      %cst_37 = arith.constant 0.000000e+00 : f32
      %73 = vector.broadcast %cst_37 : f32 to vector<128x128xf32>
      %c0_38 = arith.constant 0 : index
      %c0_39 = arith.constant 0 : index
      %74 = vector.load %arg10[%c0_38, %c0_39] : memref<128x128xf32, #tpu.memory_space<vmem>>, vector<128x128xf32>
      tpu.vector_store %arg10[%c0_38, %c0_39], %73 {strides = array<i32>} : memref<128x128xf32, #tpu.memory_space<vmem>>, vector<128x128xf32>,
    } else {
    }
    %32 = vector.extract_strided_slice %28 {offsets = [0, 0], sizes = [128, 128], strides = [1, 1]} : vector<128x256xf32> to vector<128x128xf32>
    %33 = vector.extract_strided_slice %28 {offsets = [0, 128], sizes = [128, 128], strides = [1, 1]} : vector<128x256xf32> to vector<128x128xf32>
    %34 = arith.maximumf %32, %33 : vector<128x128xf32>
    %c0_10 = arith.constant 0 : index
    %c0_11 = arith.constant 0 : index
    %35 = vector.load %arg7[%c0_10, %c0_11] : memref<128x128xf32, #tpu.memory_space<vmem>>, vector<128x128xf32>
    %36 = arith.maximumf %35, %34 : vector<128x128xf32>
    %37 = arith.subf %35, %36 : vector<128x128xf32>
    %38 = math.exp %37 : vector<128x128xf32>
    %39 = vector.extract_strided_slice %28 {offsets = [0, 0], sizes = [128, 128], strides = [1, 1]} : vector<128x256xf32> to vector<128x128xf32>
    %40 = arith.subf %39, %36 : vector<128x128xf32>
    %41 = math.exp %40 : vector<128x128xf32>
    %42 = vector.extract_strided_slice %28 {offsets = [0, 128], sizes = [128, 128], strides = [1, 1]} : vector<128x256xf32> to vector<128x128xf32>
    %43 = arith.subf %42, %36 : vector<128x128xf32>
    %44 = math.exp %43 : vector<128x128xf32>
    %45 = arith.addf %41, %44 : vector<128x128xf32>
    %c0_12 = arith.constant 0 : index
    %c0_13 = arith.constant 0 : index
    %46 = vector.load %arg8[%c0_12, %c0_13] : memref<128x128xf32, #tpu.memory_space<vmem>>, vector<128x128xf32>
    %47 = arith.mulf %38, %46 : vector<128x128xf32>
    %48 = arith.addf %47, %45 : vector<128x128xf32>
    %c0_14 = arith.constant 0 : index
    %c0_15 = arith.constant 0 : index
    %49 = vector.load %arg8[%c0_14, %c0_15] : memref<128x128xf32, #tpu.memory_space<vmem>>, vector<128x128xf32>
    tpu.vector_store %arg8[%c0_14, %c0_15], %48 {strides = array<i32>} : memref<128x128xf32, #tpu.memory_space<vmem>>, vector<128x128xf32>,
    %c0_16 = arith.constant 0 : index
    %c0_17 = arith.constant 0 : index
    %50 = vector.load %arg7[%c0_16, %c0_17] : memref<128x128xf32, #tpu.memory_space<vmem>>, vector<128x128xf32>
    tpu.vector_store %arg7[%c0_16, %c0_17], %36 {strides = array<i32>} : memref<128x128xf32, #tpu.memory_space<vmem>>, vector<128x128xf32>,
    %c0_18 = arith.constant 0 : index
    %c0_19 = arith.constant 0 : index
    %51 = vector.load %arg9[%c0_18, %c0_19] : memref<128x128xf32, #tpu.memory_space<vmem>>, vector<128x128xf32>
    %52 = arith.mulf %26, %5 : vector<128x256xf32>
    %53 = vector.extract_strided_slice %52 {offsets = [0, 0], sizes = [128, 128], strides = [1, 1]} : vector<128x256xf32> to vector<128x128xf32>
    %54 = vector.extract_strided_slice %52 {offsets = [0, 128], sizes = [128, 128], strides = [1, 1]} : vector<128x256xf32> to vector<128x128xf32>
    %55 = arith.addf %53, %54 : vector<128x128xf32>
    %56 = arith.addf %51, %55 : vector<128x128xf32>
    %c0_20 = arith.constant 0 : index
    %c0_21 = arith.constant 0 : index
    %57 = vector.load %arg9[%c0_20, %c0_21] : memref<128x128xf32, #tpu.memory_space<vmem>>, vector<128x128xf32>
    tpu.vector_store %arg9[%c0_20, %c0_21], %56 {strides = array<i32>} : memref<128x128xf32, #tpu.memory_space<vmem>>, vector<128x128xf32>,
    %c0_22 = arith.constant 0 : index
    %c0_23 = arith.constant 0 : index
    %58 = vector.load %arg10[%c0_22, %c0_23] : memref<128x128xf32, #tpu.memory_space<vmem>>, vector<128x128xf32>
    %59 = vector.extract_strided_slice %26 {offsets = [0, 0], sizes = [128, 128], strides = [1, 1]} : vector<128x256xf32> to vector<128x128xf32>
    %60 = vector.extract_strided_slice %26 {offsets = [0, 128], sizes = [128, 128], strides = [1, 1]} : vector<128x256xf32> to vector<128x128xf32>
    %61 = arith.addf %59, %60 : vector<128x128xf32>
    %62 = arith.addf %58, %61 : vector<128x128xf32>
    %c0_24 = arith.constant 0 : index
    %c0_25 = arith.constant 0 : index
    %63 = vector.load %arg10[%c0_24, %c0_25] : memref<128x128xf32, #tpu.memory_space<vmem>>, vector<128x128xf32>
    tpu.vector_store %arg10[%c0_24, %c0_25], %62 {strides = array<i32>} : memref<128x128xf32, #tpu.memory_space<vmem>>, vector<128x128xf32>,
    %c0_i32_26 = arith.constant 0 : i32
    %64 = arith.cmpi eq, %arg1, %c0_i32_26 : i32
    %65 = arith.extui %64 : i1 to i32
    %c0_i32_27 = arith.constant 0 : i32
    %66 = arith.cmpi ne, %65, %c0_i32_27 : i32
    scf.if %66 {
      %c0_28 = arith.constant 0 : index
      %c0_29 = arith.constant 0 : index
      %67 = vector.load %arg7[%c0_28, %c0_29] : memref<128x128xf32, #tpu.memory_space<vmem>>, vector<128x128xf32>
      %cst_30 = arith.constant dense<0xFF800000> : vector<128xf32>
      %68 = vector.multi_reduction <maximumf>, %67, %cst_30 [1] : vector<128x128xf32> to vector<128xf32>
      %69 = vector.shape_cast %68 : vector<128xf32> to vector<128x1xf32>
      %c0_31 = arith.constant 0 : index
      %c0_32 = arith.constant 0 : index
      %70 = vector.load %arg8[%c0_31, %c0_32] : memref<128x128xf32, #tpu.memory_space<vmem>>, vector<128x128xf32>
      %71 = vector.broadcast %69 : vector<128x1xf32> to vector<128x128xf32>
      %72 = arith.subf %67, %71 : vector<128x128xf32>
      %73 = math.exp %72 : vector<128x128xf32>
      %74 = arith.mulf %70, %73 : vector<128x128xf32>
      %cst_33 = arith.constant dense<0.000000e+00> : vector<128xf32>
      %75 = vector.multi_reduction <add>, %74, %cst_33 [1] : vector<128x128xf32> to vector<128xf32>
      %76 = vector.shape_cast %75 : vector<128xf32> to vector<128x1xf32>
      %77 = math.log %76 : vector<128x1xf32>
      %78 = arith.addf %69, %77 : vector<128x1xf32>
      %c0_34 = arith.constant 0 : index
      %c0_35 = arith.constant 0 : index
      %79 = vector.load %arg9[%c0_34, %c0_35] : memref<128x128xf32, #tpu.memory_space<vmem>>, vector<128x128xf32>
      %cst_36 = arith.constant dense<0.000000e+00> : vector<128xf32>
      %80 = vector.multi_reduction <add>, %79, %cst_36 [1] : vector<128x128xf32> to vector<128xf32>
      %81 = vector.shape_cast %80 : vector<128xf32> to vector<128x1xf32>
      %c0_37 = arith.constant 0 : index
      %c0_38 = arith.constant 0 : index
      %82 = vector.load %arg10[%c0_37, %c0_38] : memref<128x128xf32, #tpu.memory_space<vmem>>, vector<128x128xf32>
      %cst_39 = arith.constant dense<0.000000e+00> : vector<128xf32>
      %83 = vector.multi_reduction <add>, %82, %cst_39 [1] : vector<128x128xf32> to vector<128xf32>
      %84 = vector.shape_cast %83 : vector<128xf32> to vector<128x1xf32>
      %85 = arith.divf %81, %84 : vector<128x1xf32>
      %86 = arith.subf %85, %78 : vector<128x1xf32>
      %cst_40 = arith.constant -1.000000e+00 : f32
      %87 = vector.broadcast %cst_40 : f32 to vector<128x1xf32>
      %88 = arith.mulf %87, %86 : vector<128x1xf32>
      %c0_41 = arith.constant 0 : index
      %c0_42 = arith.constant 0 : index
      %89 = vector.load %arg6[%c0_41, %c0_42] : memref<128x1xf32, #tpu.memory_space<vmem>>, vector<128x1xf32>
      tpu.vector_store %arg6[%c0_41, %c0_42], %88 {strides = array<i32>} : memref<128x1xf32, #tpu.memory_space<vmem>>, vector<128x1xf32>,
    } else {
    }
    return
  }
  func.func @transform_0(%arg0: i32, %arg1: i32) -> (i32, i32) {
    %c0_i32 = arith.constant 0 : i32
    %c0_i32_0 = arith.constant 0 : i32
    return %arg0, %c0_i32 : i32, i32
  }
  func.func @transform_1(%arg0: i32, %arg1: i32) -> (i32, i32) {
    %c0_i32 = arith.constant 0 : i32
    %c0_i32_0 = arith.constant 0 : i32
    return %c0_i32, %arg1 : i32, i32
  }
  func.func @transform_2(%arg0: i32, %arg1: i32) -> (i32, i32) {
    %c0_i32 = arith.constant 0 : i32
    %c0_i32_0 = arith.constant 0 : i32
    return %arg0, %c0_i32 : i32, i32
  }
  func.func @transform_3(%arg0: i32, %arg1: i32) -> (i32, i32) {
    %c0_i32 = arith.constant 0 : i32
    %c0_i32_0 = arith.constant 0 : i32
    %c0_i32_1 = arith.constant 0 : i32
    return %c0_i32, %c0_i32_0 : i32, i32
  }
  func.func @transform_4(%arg0: i32, %arg1: i32) -> (i32, i32) {
    %c0_i32 = arith.constant 0 : i32
    %c0_i32_0 = arith.constant 0 : i32
    return %arg0, %c0_i32 : i32, i32
  }
}

</mosaic_0001>

<bundles_post_ra>
// kernel: tpu_custom_call.1
= control target key start
LH: loop header
LB: loop body
LE: loop exit
PB: predicated region body
PF: predicated region fallthrough
CT: control target
= control target key end

     0   :  { %9 = vsyncpa [#allocation7], 0  ;;  %s1843_s15 = smov [#allocation6]   ;;  %s2888_s0 = inlined_call_operand.vmem [shape: s32[128,1], index: 0, kind: input, shape index: {}]   ;;  %s2889_s1 = inlined_call_operand.vmem [shape: s32[1,256], index: 1, kind: input, shape index: {}]   ;;  %s2890_s2 = inlined_call_operand.vmem [shape: f32[128,128], index: 2, kind: input, shape index: {}]   ;;  %s2891_s3 = inlined_call_operand.hbm [shape: f32[256,128], index: 3, kind: input, shape index: {}]   ;;  %s2892_s4 = inlined_call_operand.vmem [shape: f32[128,1], index: 4, kind: output, shape index: {}]  }
   0x1   :  { %s21_s16 = sshll.u32 %s1843_s15, 4  ;;  %s1819_s19 = scalar_lea.hbm %s2891_s3, 4096  ;;  %s22_s16 = int_to_ptr.vmem [resolvable:$true] %s21_s16 }
   0x2   :  { %p1820_p0 = scmp.ne.s32.totalorder %s2891_s3, %s1819_s19  ;;  %p1823_p1 = scmp.lt.u32.totalorder %s1819_s19, %s2891_s3 }
   0x4   :  { %p1825_p2 = pnand %p1823_p1, %p1820_p0 }
   0x6   :  { %1828 = shalt.err (!%p1825_p2)
}
   0x7   :  { %s1829_s24 = scalar_lea.vmem %s22_s16, 4096  ;;  %p1834_p4 = scmp.lt.s32.totalorder %s22_s16, %s22_s16 }
   0x8   :  { %p1830_p3 = scmp.ne.s32.totalorder %s22_s16, %s1829_s24  ;;  %p1835_p5 = scmp.lt.s32.totalorder %s1829_s24, %s1829_s24 }
   0xa   :  { %p1836_p6 = por %p1835_p5, %p1834_p4 }
   0xc   :  { %p1837_p7 = pnand %p1836_p6, %p1830_p3 }
   0xe   :  { %1840 = shalt.err (!%p1837_p7)
}
   0xf   :  { %s1844_s25 = smov 128   ;;  %s1845_s26 = smov 8  }
  0x10   :  { %27 = dma.hbm_to_vmem [thread:$0]  %s2891_s3, 4096, %s22_s16, [#allocation7], %s1844_s25, %s1844_s25, %s1845_s26  }
  0x11   :  { %1841 = dma.done.wait [#allocation7], 4096  }
  0x12   :  { %1842 = vsyncadd [#allocation7], 4294963200  ;;  %v1846_v0 = vmov 0   ;;  %v49_v1 = vld [vmem:[#allocation6 + $0x80] sm:$0xff]  ;;  %v50_v2 = vld [vmem:[#allocation6 + $0x88] sm:$0xff]  ;;  %vm2896_vm10 = vmmov 1  }
  0x13   :  { %1658 = vset.pattern.permute.xlu1 %v1846_v0  ;;  %1657 = vset.pattern.permute.xlu0 %v1846_v0  ;;  %v33_v3 = vld [vmem:[#allocation6] sm:$0xff]  ;;  %v1603_v4 = vpack.c.bf16 %v50_v2, %v49_v1  ;;  %v34_v5 = vld [vmem:[#allocation6 + $0x8] sm:$0xff]  ;;  %v51_v6 = vld [vmem:[#allocation6 + $0x90] sm:$0xff] }
  0x14   :  { %v52_v7 = vld [vmem:[#allocation6 + $0x98] sm:$0xff]  ;;  %v1605_v8 = vpack.c.bf16 %v34_v5, %v33_v3  ;;  %v35_v10 = vld [vmem:[#allocation6 + $0x10] sm:$0xff]  ;;  %v53_v12 = vld [vmem:[#allocation6 + $0xa0] sm:$0xff] }
  0x15   :  { %v1607_v9 = vpack.c.bf16 %v52_v7, %v51_v6  ;;  %1604 = vmatprep.subr.bf16.mxu0 %v1603_v4  ;;  %1635 = vmatprep.subr.bf16.mxu1 %v1603_v4  ;;  %v36_v11 = vld [vmem:[#allocation6 + $0x18] sm:$0xff]  ;;  %v54_v13 = vld [vmem:[#allocation6 + $0xa8] sm:$0xff]  ;;  %v1889_v16 = vld [vmem:[%s2890_s2] sm:$0xff] }
  0x16   :  { %1606 = vmatpush3.bf16.xpose.msra.mxu0 %v1605_v8  ;;  %1643 = vmatpush3.bf16.xpose.msra.mxu1 %v1605_v8  ;;  %v1609_v14 = vpack.c.bf16 %v36_v11, %v35_v10  ;;  %v1611_v15 = vpack.c.bf16 %v54_v13, %v53_v12  ;;  %v1895_v17 = vld [vmem:[%s2890_s2 + $0x40] sm:$0xff]  ;;  %v38_v19 = vld [vmem:[#allocation6 + $0x28] sm:$0xff]  ;;  %v55_v20 = vld [vmem:[#allocation6 + $0xb0] sm:$0xff] }
  0x17   :  { %1608 = vmatprep.subr.bf16.mxu0 %v1607_v9  ;;  %1636 = vmatprep.subr.bf16.mxu1 %v1607_v9  ;;  %v37_v18 = vld [vmem:[#allocation6 + $0x20] sm:$0xff]  ;;  %v56_v21 = vld [vmem:[#allocation6 + $0xb8] sm:$0xff]  ;;  %v351_v23 = vld [vmem:[%s2888_s0 + $0x10] sm:$0xff] }
  0x18   :  { %1571 = vmatprep.mubr.f32.mxu0 %v1889_v16  ;;  %1587 = vmatprep.mubr.f32.mxu1 %v1895_v17  ;;  %v1613_v22 = vpack.c.bf16 %v38_v19, %v37_v18  ;;  %v349_v24 = vld [vmem:[%s2888_s0] sm:$0xff]  ;;  %v1615_v25 = vpack.c.bf16 %v56_v21, %v55_v20  ;;  %v352_v26 = vld [vmem:[%s2888_s0 + $0x18] sm:$0xff]  ;;  %v350_v27 = vld [vmem:[%s2888_s0 + $0x8] sm:$0xff] }
  0x19   :  { %373 = vperm.xlu1 %1658, %v351_v23   ;;  %367 = vperm.xlu0 %1657, %v349_v24   ;;  %v39_v28 = vld [vmem:[#allocation6 + $0x30] sm:$0xff]  ;;  %v40_v29 = vld [vmem:[#allocation6 + $0x38] sm:$0xff]  ;;  %v57_v30 = vld [vmem:[#allocation6 + $0xc0] sm:$0xff] }
  0x1a   :  { %v58_v31 = vld [vmem:[#allocation6 + $0xc8] sm:$0xff]  ;;  %v353_v33 = vld [vmem:[%s2888_s0 + $0x20] sm:$0xff]  ;;  %v1617_v34 = vpack.c.bf16 %v40_v29, %v39_v28  ;;  %v355_v37 = vld [vmem:[%s2888_s0 + $0x30] sm:$0xff] }
  0x1b   :  { %v354_v32 = vld [vmem:[%s2888_s0 + $0x28] sm:$0xff]  ;;  %v1619_v35 = vpack.c.bf16 %v58_v31, %v57_v30  ;;  %v357_v36 = vld [vmem:[%s2888_s0 + $0x40] sm:$0xff]  ;;  %v59_v40 = vld [vmem:[#allocation6 + $0xd0] sm:$0xff] }
  0x1c   :  { %v41_v38 = vld [vmem:[#allocation6 + $0x40] sm:$0xff]  ;;  %v42_v39 = vld [vmem:[#allocation6 + $0x48] sm:$0xff]  ;;  %v60_v41 = vld [vmem:[#allocation6 + $0xd8] sm:$0xff] }
  0x1d   :  { %376 = vperm.xlu1 %1658, %v352_v26   ;;  %370 = vperm.xlu0 %1657, %v350_v27   ;;  %v358_v42 = vld [vmem:[%s2888_s0 + $0x48] sm:$0xff]  ;;  %v356_v43 = vld [vmem:[%s2888_s0 + $0x38] sm:$0xff]  ;;  %v1621_v44 = vpack.c.bf16 %v42_v39, %v41_v38  ;;  %v1623_v45 = vpack.c.bf16 %v60_v41, %v59_v40  ;;  %v359_v46 = vld [vmem:[%s2888_s0 + $0x50] sm:$0xff] }
  0x1e   :  { %1610 = vmatpush3.bf16.xpose.msra.mxu0 %v1609_v14  ;;  %1644 = vmatpush3.bf16.xpose.msra.mxu1 %v1609_v14  ;;  %v360_v47 = vld [vmem:[%s2888_s0 + $0x58] sm:$0xff]  ;;  %v43_v48 = vld [vmem:[#allocation6 + $0x50] sm:$0xff]  ;;  %v61_v50 = vld [vmem:[#allocation6 + $0xe0] sm:$0xff] }
  0x1f   :  { %1612 = vmatprep.subr.bf16.mxu0 %v1611_v15  ;;  %1637 = vmatprep.subr.bf16.mxu1 %v1611_v15  ;;  %v44_v49 = vld [vmem:[#allocation6 + $0x58] sm:$0xff]  ;;  %v62_v51 = vld [vmem:[#allocation6 + $0xe8] sm:$0xff]  ;;  %v361_v52 = vld [vmem:[%s2888_s0 + $0x60] sm:$0xff] }
  0x20   :  { %v362_v53 = vld [vmem:[%s2888_s0 + $0x68] sm:$0xff]  ;;  %v1625_v54 = vpack.c.bf16 %v44_v49, %v43_v48  ;;  %v1627_v55 = vpack.c.bf16 %v62_v51, %v61_v50  ;;  %v45_v56 = vld [vmem:[#allocation6 + $0x60] sm:$0xff]  ;;  %v63_v58 = vld [vmem:[#allocation6 + $0xf0] sm:$0xff] }
  0x21   :  { %382 = vperm.xlu1 %1658, %v354_v32   ;;  %379 = vperm.xlu0 %1657, %v353_v33   ;;  %v46_v57 = vld [vmem:[#allocation6 + $0x68] sm:$0xff]  ;;  %v64_v59 = vld [vmem:[#allocation6 + $0xf8] sm:$0xff]  ;;  %v47_v62 = vld [vmem:[#allocation6 + $0x70] sm:$0xff] }
  0x22   :  { %v1629_v60 = vpack.c.bf16 %v46_v57, %v45_v56  ;;  %v1631_v61 = vpack.c.bf16 %v64_v59, %v63_v58  ;;  %v48_v63 = vld [vmem:[#allocation6 + $0x78] sm:$0xff]  ;;  %v66_v1 = vld [vmem:[%s2890_s2 + $0x8] sm:$0xff]  ;;  %v67_v3 = vld [vmem:[%s2890_s2 + $0x10] sm:$0xff] }
  0x23   :  { %v1633_v0 = vpack.c.bf16 %v48_v63, %v47_v62  ;;  %v74_v2 = vld [vmem:[%s2890_s2 + $0x48] sm:$0xff]  ;;  %v75_v4 = vld [vmem:[%s2890_s2 + $0x50] sm:$0xff]  ;;  %v68_v5 = vld [vmem:[%s2890_s2 + $0x18] sm:$0xff] }
  0x24   :  { %v76_v6 = vld [vmem:[%s2890_s2 + $0x58] sm:$0xff]  ;;  %v69_v7 = vld [vmem:[%s2890_s2 + $0x20] sm:$0xff]  ;;  %v70_v9 = vld [vmem:[%s2890_s2 + $0x28] sm:$0xff] }
  0x25   :  { %391 = vperm.xlu1 %1658, %v357_v36   ;;  %385 = vperm.xlu0 %1657, %v355_v37   ;;  %v77_v8 = vld [vmem:[%s2890_s2 + $0x60] sm:$0xff]  ;;  %v78_v10 = vld [vmem:[%s2890_s2 + $0x68] sm:$0xff]  ;;  %v71_v11 = vld [vmem:[%s2890_s2 + $0x30] sm:$0xff] }
  0x26   :  { %1614 = vmatpush3.bf16.xpose.msra.mxu0 %v1613_v22  ;;  %1645 = vmatpush3.bf16.xpose.msra.mxu1 %v1613_v22  ;;  %v79_v12 = vld [vmem:[%s2890_s2 + $0x70] sm:$0xff]  ;;  %v72_v13 = vld [vmem:[%s2890_s2 + $0x38] sm:$0xff] }
  0x27   :  { %1616 = vmatprep.subr.bf16.mxu0 %v1615_v25  ;;  %1638 = vmatprep.subr.bf16.mxu1 %v1615_v25  ;;  %v80_v14 = vld [vmem:[%s2890_s2 + $0x78] sm:$0xff]  ;;  %v365_v25 = vld [vmem:[%s2889_s1] sm:$0x3] }
  0x29   :  { %394 = vperm.xlu1 %1658, %v358_v42   ;;  %388 = vperm.xlu0 %1657, %v356_v43  }
  0x2d   :  { %397 = vperm.xlu0 %1657, %v359_v46   ;;  %400 = vperm.xlu1 %1658, %v360_v47  }
  0x2e   :  { %1618 = vmatpush3.bf16.xpose.msra.mxu0 %v1617_v34  ;;  %1646 = vmatpush3.bf16.xpose.msra.mxu1 %v1617_v34 }
  0x2f   :  { %1620 = vmatprep.subr.bf16.mxu0 %v1619_v35  ;;  %1639 = vmatprep.subr.bf16.mxu1 %v1619_v35  ;;  %v2894_v35 = vmov 0.0  }
  0x31   :  { %403 = vperm.xlu0 %1657, %v361_v52   ;;  %406 = vperm.xlu1 %1658, %v362_v53  }
  0x36   :  { %1622 = vmatpush3.bf16.xpose.msra.mxu0 %v1621_v44  ;;  %1647 = vmatpush3.bf16.xpose.msra.mxu1 %v1621_v44 }
  0x37   :  { %1624 = vmatprep.subr.bf16.mxu0 %v1623_v45  ;;  %1640 = vmatprep.subr.bf16.mxu1 %v1623_v45 }
  0x3e   :  { %1626 = vmatpush3.bf16.xpose.msra.mxu0 %v1625_v54  ;;  %1648 = vmatpush3.bf16.xpose.msra.mxu1 %v1625_v54 }
  0x3f   :  { %1628 = vmatprep.subr.bf16.mxu0 %v1627_v55  ;;  %1641 = vmatprep.subr.bf16.mxu1 %v1627_v55 }
  0x46   :  { %1630 = vmatpush3.bf16.xpose.msra.mxu0 %v1629_v60  ;;  %1649 = vmatpush3.bf16.xpose.msra.mxu1 %v1629_v60 }
  0x47   :  { %1632 = vmatprep.subr.bf16.mxu0 %v1631_v61  ;;  %1642 = vmatprep.subr.bf16.mxu1 %v1631_v61 }
  0x4e   :  { %1634 = vmatpush3.bf16.xpose.msra.mxu0 %v1633_v0  ;;  %1650 = vmatpush3.bf16.xpose.msra.mxu1 %v1633_v0 }
  0x55   :  { %1572 = vmatmul.mubr.f32.vlgmr.msra.gmra.mrb[0].mxu0 %v1889_v16  ;;  %1588 = vmatmul.mubr.f32.vlgmr.msra.gmra.mrb[0].mxu1 %v1895_v17  ;;  %v243_v16 = vlaneseq }
  0x56   :  { %1573 = vmatprep.mubr.f32.mxu0 %v66_v1  ;;  %1589 = vmatprep.mubr.f32.mxu1 %v74_v2 }
  0x57   :  { %v1988_v18 = vshrl.u32 %v243_v16, 7  ;;  %v1990_v19 = vand.u32 127, %v243_v16 }
  0x59   :  { %1574 = vmatmul.mubr.f32.gmra.mrb[2].mxu0 %v66_v1  ;;  %1590 = vmatmul.mubr.f32.gmra.mrb[2].mxu1 %v74_v2  ;;  %v252_v20 = vadd.s32 64, %v1988_v18  ;;  %v245_v22 = vadd.s32 8, %v1988_v18  ;;  %v416_v23 = vsub.s32 0, %v1988_v18  ;;  %v253_v24 = vadd.s32 72, %v1988_v18 }
  0x5a   :  { %1575 = vmatprep.mubr.f32.mxu0 %v67_v3  ;;  %1591 = vmatprep.mubr.f32.mxu1 %v75_v4  ;;  %vm283_vm0 = vcmp.eq.s32.totalorder %v1988_v18, %v1990_v19  ;;  %vm2893_vm1 = vcmp.ge.s32.totalorder %v1990_v19, 16  ;;  %v254_v40 = vadd.s32 80, %v1988_v18  ;;  %v246_v52 = vadd.s32 16, %v1988_v18 }
  0x5b   :  { %vm299_vm2 = vcmp.eq.s32.totalorder %v252_v20, %v1990_v19  ;;  %vm285_vm3 = vcmp.eq.s32.totalorder %v245_v22, %v1990_v19  ;;  %v2006_v27 = vrot.slane %v365_v25, %v416_v23  ;;  %vm2010_vm4 = vmor %vm283_vm0, %vm2893_vm1  ;;  %vm301_vm5 = vcmp.eq.s32.totalorder %v253_v24, %v1990_v19 }
  0x5c   :  { %vm2017_vm6 = vmor %vm299_vm2, %vm2893_vm1  ;;  %v247_v1 = vadd.s32 24, %v1988_v18  ;;  %v255_v2 = vadd.s32 88, %v1988_v18  ;;  %v248_v23 = vadd.s32 32, %v1988_v18  ;;  %v256_v28 = vadd.s32 96, %v1988_v18 }
  0x5d   :  { %1576 = vmatmul.mubr.f32.gmra.mrb[4].mxu0 %v67_v3  ;;  %1592 = vmatmul.mubr.f32.gmra.mrb[4].mxu1 %v75_v4  ;;  %vm2023_vm7 = vmor %vm285_vm3, %vm2893_vm1 }
  0x5e   :  { %1577 = vmatprep.mubr.f32.mxu0 %v68_v5  ;;  %1593 = vmatprep.mubr.f32.mxu1 %v76_v6  ;;  %vm2029_vm8 = vmor %vm301_vm5, %vm2893_vm1 }
  0x5f   :  { %vm454_vm11 = vmxor %vm2010_vm4, %vm2896_vm10 }
  0x60   :  { %vm470_vm13 = vmxor %vm2017_vm6, %vm2896_vm10 }
  0x61   :  { %1578 = vmatmul.mubr.f32.gmra.mrb[6].mxu0 %v68_v5  ;;  %1594 = vmatmul.mubr.f32.gmra.mrb[6].mxu1 %v76_v6  ;;  %vm456_vm15 = vmxor %vm2023_vm7, %vm2896_vm10 }
  0x62   :  { %1579 = vmatprep.mubr.f32.mxu0 %v69_v7  ;;  %1595 = vmatprep.mubr.f32.mxu1 %v77_v8  ;;  %vm472_vm1 = vmxor %vm2029_vm8, %vm2896_vm10 }
  0x65   :  { %1580 = vmatmul.mubr.f32.gmra.mrb[8].mxu0 %v69_v7  ;;  %1596 = vmatmul.mubr.f32.gmra.mrb[8].mxu1 %v77_v8 }
  0x66   :  { %1581 = vmatprep.mubr.f32.mxu0 %v70_v9  ;;  %1597 = vmatprep.mubr.f32.mxu1 %v78_v10 }
  0x69   :  { %1582 = vmatmul.mubr.f32.gmra.mrb[10].mxu0 %v70_v9  ;;  %1598 = vmatmul.mubr.f32.gmra.mrb[10].mxu1 %v78_v10 }
  0x6a   :  { %1583 = vmatprep.mubr.f32.mxu0 %v71_v11  ;;  %1599 = vmatprep.mubr.f32.mxu1 %v79_v12 }
  0x6d   :  { %1584 = vmatmul.mubr.f32.gmra.mrb[12].mxu0 %v71_v11  ;;  %1600 = vmatmul.mubr.f32.gmra.mrb[12].mxu1 %v79_v12 }
  0x6e   :  { %1585 = vmatprep.mubr.f32.mxu0 %v72_v13  ;;  %1601 = vmatprep.mubr.f32.mxu1 %v80_v14 }
  0x71   :  { %1586 = vmatmul.mubr.f32.gmra.mrb[14].mxu0 %v72_v13  ;;  %1602 = vmatmul.mubr.f32.gmra.mrb[14].mxu1 %v80_v14  ;;  %v2944_v13 = vmov 0 }
  0x98   :  { %v1984_v15 = vpop.permute.xlu1 %373  ;;  %v368_v26 = vpop.permute.xlu0 %367 }
  0x99   :  { %vm422_vm9 = vcmp.eq.s32.totalorder %v368_v26, %v2006_v27 }
  0x9a   :  { %vm486_vm0 = vmand %vm422_vm9, %vm454_vm11 }
  0x9b   :  { %v2050_v36 = vsel %vm486_vm0, 1.0, %v2894_v35 }
  0x9c   :  { %v1986_v17 = vpop.permute.xlu1 %376  ;;  %v371_v33 = vpop.permute.xlu0 %370 }
  0x9d   :  { %vm424_vm14 = vcmp.eq.s32.totalorder %v371_v33, %v2006_v27 }
  0x9e   :  { %vm488_vm3 = vmand %vm424_vm14, %vm456_vm15 }
  0x9f   :  { %v2057_v41 = vsel %vm488_vm3, 1.0, %v2894_v35  ;;  %vm291_vm3 = vcmp.eq.s32.totalorder %v248_v23, %v1990_v19 }
  0xa0   :  { %v1993_v21 = vpop.permute.xlu1 %382 }
  0xa4   :  { %v392_v30 = vpop.permute.xlu1 %391 }
  0xa5   :  { %vm438_vm12 = vcmp.eq.s32.totalorder %v392_v30, %v2006_v27 }
  0xa6   :  { %vm502_vm2 = vmand %vm438_vm12, %vm470_vm13  ;;  %vm305_vm13 = vcmp.eq.s32.totalorder %v255_v2, %v1990_v19  ;;  %v2219_v2 = vpop.permute.xlu0 %379 }
  0xa7   :  { %v2053_v37 = vsel %vm502_vm2, 1.0, %v2894_v35 }
  0xa8   :  { %v395_v34 = vpop.permute.xlu1 %394 }
  0xa9   :  { %vm440_vm5 = vcmp.eq.s32.totalorder %v395_v34, %v2006_v27 }
  0xaa   :  { %vm504_vm9 = vmand %vm440_vm5, %vm472_vm1  ;;  %vm303_vm1 = vcmp.eq.s32.totalorder %v254_v40, %v1990_v19  ;;  %vm307_vm5 = vcmp.eq.s32.totalorder %v256_v28, %v1990_v19  ;;  %v258_v28 = vadd.s32 112, %v1988_v18  ;;  %v386_v23 = vpop.permute.xlu0 %385 }
  0xab   :  { %v2073_v53 = vsel %vm504_vm9, 1.0, %v2894_v35 }
 0x128   :  { %v147_v38 = vpop.f32.mrb[0].mxu0  ;;  %v195_v39 = vpop.f32.mrb[0].mxu1 }
 0x129   :  { %v2061_v42 = vsel %vm2010_vm4, -1e+30, %v147_v38  ;;  %v2065_v43 = vsel %vm2017_vm6, -1e+30, %v195_v39  ;;  %v149_v44 = vpop.f32.mrb[1].mxu0  ;;  %v197_v45 = vpop.f32.mrb[1].mxu1  ;;  %v986_v46 = vmul.f32 %v2050_v36, %v147_v38  ;;  %v1002_v47 = vmul.f32 %v2053_v37, %v195_v39 }
 0x12a   :  { %v682_v48 = vmax.f32 %v2061_v42, -1e+30  ;;  %v690_v49 = vmax.f32 %v2065_v43, -1e+30  ;;  %v987_v50 = vmul.f32 0.0, %v149_v44  ;;  %v1003_v51 = vmul.f32 0.0, %v197_v45 }
 0x12b   :  { %vm287_vm4 = vcmp.eq.s32.totalorder %v246_v52, %v1990_v19  ;;  %vm2943_vm6 = vcmp.ge.s32.totalorder %v1990_v19, 16  ;;  %v249_v39 = vadd.s32 40, %v1988_v18 }
 0x12c   :  { %v2075_v54 = vmax.f32 %v682_v48, -1e+30  ;;  %v2077_v55 = vmax.f32 %v690_v49, -1e+30  ;;  %v153_v56 = vpop.f32.mrb[2].mxu0  ;;  %v201_v57 = vpop.f32.mrb[2].mxu1  ;;  %v2079_v58 = vadd.f32 %v987_v50, %v986_v46  ;;  %v2081_v59 = vadd.f32 %v1003_v51, %v1002_v47  ;;  %vm2947_vm11 = vmmov %vm2943_vm6 }
 0x12d   :  { %v2085_v60 = vsel %vm2023_vm7, -1e+30, %v153_v56  ;;  %v2089_v61 = vsel %vm2029_vm8, -1e+30, %v201_v57  ;;  %v155_v62 = vpop.f32.mrb[3].mxu0  ;;  %v203_v63 = vpop.f32.mrb[3].mxu1  ;;  %v988_v0 = vmul.f32 %v2057_v41, %v153_v56  ;;  %v1004_v3 = vmul.f32 %v2073_v53, %v201_v57  ;;  %vm2113_vm7 = vmor %vm303_vm1, %vm2943_vm6 }
 0x12e   :  { %2940 = vst [vmem:[#allocation9_spill] sm:$0xff] %v2079_v58  ;;  %2941 = vst [vmem:[#allocation10_spill] sm:$0xff] %v2081_v59  ;;  %1165 = vmax.xlane.f32.xlu0 %v2077_v55  ;;  %1149 = vmax.xlane.f32.xlu1 %v2075_v54  ;;  %v683_v4 = vmax.f32 %v2085_v60, -1e+30  ;;  %v691_v5 = vmax.f32 %v2089_v61, -1e+30  ;;  %vm289_vm8 = vcmp.eq.s32.totalorder %v247_v1, %v1990_v19 }
 0x12f   :  { %v989_v6 = vmul.f32 0.0, %v155_v62  ;;  %v1005_v7 = vmul.f32 0.0, %v203_v63  ;;  %v2945_v13 = vsel %vm2113_vm7, 4294967295, %v2944_v13  ;;  %vm2122_vm12 = vmor %vm287_vm4, %vm2947_vm11  ;;  %v257_v49 = vadd.s32 104, %v1988_v18 }
 0x130   :  { %v2101_v8 = vmax.f32 %v683_v4, -1e+30  ;;  %v2103_v9 = vmax.f32 %v691_v5, -1e+30  ;;  %v2107_v11 = vpop.f32.mrb[4].mxu0  ;;  %v2109_v12 = vpop.f32.mrb[4].mxu1  ;;  %vm2950_vm14 = vmmov %vm2943_vm6 }
 0x131   :  { %v2105_v10 = vadd.f32 %v989_v6, %v988_v0  ;;  %v2118_v14 = vadd.f32 %v1005_v7, %v1004_v3  ;;  %v2126_v20 = vpop.f32.mrb[5].mxu0  ;;  %v2130_v22 = vpop.f32.mrb[5].mxu1  ;;  %v2137_v24 = vsel %vm2122_vm12, -1e+30, %v2107_v11  ;;  %v2147_v29 = vsel %vm2113_vm7, -1e+30, %v2109_v12  ;;  %vm2151_vm15 = vmor %vm289_vm8, %vm2950_vm14 }
 0x132   :  { %1167 = vmax.xlane.f32.xlu1 %v2103_v9  ;;  %1151 = vmax.xlane.f32.xlu0 %v2101_v8  ;;  %v684_v31 = vmax.f32 %v2137_v24, -1e+30  ;;  %vm2953_vm0 = vmmov %vm2943_vm6  ;;  %v692_v44 = vmax.f32 %v2147_v29, -1e+30  ;;  %v2962_v63 = vmov 0  ;;  %vm293_vm8 = vcmp.eq.s32.totalorder %v249_v39, %v1990_v19 }
 0x133   :  { %2942 = vst [vmem:[#allocation11_spill] sm:$0xff] %v2105_v10  ;;  %2946 = vst [vmem:[#allocation12_spill] sm:$0xff] %v2118_v14  ;;  %vm309_vm11 = vcmp.eq.s32.totalorder %v257_v49, %v1990_v19  ;;  %v250_v1 = vadd.s32 48, %v1988_v18  ;;  %v251_v49 = vadd.s32 56, %v1988_v18  ;;  %v259_v59 = vadd.s32 120, %v1988_v18 }
 0x134   :  { %v2139_v25 = vpop.f32.mrb[6].mxu0  ;;  %v2141_v26 = vpop.f32.mrb[6].mxu1  ;;  %vm2158_vm2 = vmor %vm305_vm13, %vm2953_vm0  ;;  %v2173_v40 = vmax.f32 %v684_v31, -1e+30  ;;  %v2213_v0 = vmax.f32 %v692_v44, -1e+30 }
 0x135   :  { %v2165_v33 = vsel %vm2151_vm15, -1e+30, %v2139_v25  ;;  %v2167_v34 = vpop.f32.mrb[7].mxu0  ;;  %v2169_v38 = vpop.f32.mrb[7].mxu1  ;;  %v2181_v46 = vsel %vm2158_vm2, -1e+30, %v2141_v26  ;;  %vm2957_vm9 = vmmov %vm2953_vm0 }
 0x136   :  { %v685_v45 = vmax.f32 %v2165_v33, -1e+30  ;;  %2956 = vst [vmem:[#allocation13_spill] sm:$0xff] %v2181_v46  ;;  %1153 = vmax.xlane.f32.xlu0 %v2173_v40  ;;  %vm2191_vm1 = vmor %vm291_vm3, %vm2957_vm9  ;;  %v693_v57 = vmax.f32 %v2181_v46, -1e+30  ;;  %vm428_vm3 = vcmp.eq.s32.totalorder %v1986_v17, %v2006_v27  ;;  %v2972_v44 = vmov 0 }
 0x137   :  { %vm2961_vm4 = vmmov %vm2953_vm0  ;;  %vm426_vm9 = vcmp.eq.s32.totalorder %v1984_v15, %v2006_v27  ;;  %v2991_v15 = vmov 0 }
 0x138   :  { %v2183_v47 = vpop.f32.mrb[8].mxu0  ;;  %v2185_v48 = vpop.f32.mrb[8].mxu1  ;;  %v2199_v56 = vmax.f32 %v685_v45, -1e+30  ;;  %vm2209_vm6 = vmor %vm307_vm5, %vm2961_vm4  ;;  %v2237_v7 = vmax.f32 %v693_v57, -1e+30 }
 0x139   :  { %v2195_v51 = vpop.f32.mrb[9].mxu0  ;;  %v2197_v52 = vpop.f32.mrb[9].mxu1  ;;  %v2205_v62 = vsel %vm2191_vm1, -1e+30, %v2183_v47  ;;  %v2963_v63 = vsel %vm2209_vm6, 4294967295, %v2962_v63  ;;  %vm2233_vm13 = vmxor %vm2151_vm15, %vm2896_vm10 }
 0x13a   :  { %2960 = vst [vmem:[#allocation14_spill] sm:$0xff] %v2205_v62  ;;  %1155 = vmax.xlane.f32.xlu1 %v2199_v56  ;;  %v686_v3 = vmax.f32 %v2205_v62, -1e+30  ;;  %v2225_v4 = vsel %vm2209_vm6, -1e+30, %v2185_v48  ;;  %1169 = vmax.xlane.f32.xlu0 %v2213_v0  ;;  %vm2967_vm14 = vmmov %vm2953_vm0 }
 0x13b   :  { %2964 = vst [vmem:[#allocation15_spill] sm:$0xff] %v2225_v4  ;;  %vm2241_vm0 = vmor %vm293_vm8, %vm2967_vm14  ;;  %v694_v30 = vmax.f32 %v2225_v4, -1e+30 }
 0x13c   :  { %v2228_v5 = vpop.f32.mrb[10].mxu0  ;;  %v2248_v31 = vmax.f32 %v686_v3, -1e+30  ;;  %v2251_v39 = vpop.f32.mrb[10].mxu1  ;;  %vm2971_vm15 = vmmov %vm2961_vm4  ;;  %vm295_vm4 = vcmp.eq.s32.totalorder %v250_v1, %v1990_v19 }
 0x13d   :  { %vm2257_vm5 = vmor %vm309_vm11, %vm2971_vm15  ;;  %v2261_v45 = vpop.f32.mrb[11].mxu0  ;;  %v2268_v57 = vsel %vm2241_vm0, -1e+30, %v2228_v5  ;;  %v2271_v3 = vpop.f32.mrb[11].mxu1  ;;  %v2305_v58 = vmax.f32 %v694_v30, -1e+30 }
 0x13e   :  { %2970 = vst [vmem:[#allocation16_spill] sm:$0xff] %v2248_v31  ;;  %v2973_v44 = vsel %vm2257_vm5, 4294967295, %v2972_v44  ;;  %2974 = vst [vmem:[#allocation17_spill] sm:$0xff] %v2268_v57  ;;  %1171 = vmax.xlane.f32.xlu1 %v2237_v7  ;;  %1157 = vmax.xlane.f32.xlu0 %v2248_v31  ;;  %v687_v10 = vmax.f32 %v2268_v57, -1e+30  ;;  %v3006_v31 = vmov 0 }
 0x13f   :  { %vm458_vm8 = vmxor %vm2122_vm12, %vm2896_vm10  ;;  %v2293_v16 = vsel %vm2257_vm5, -1e+30, %v2251_v39  ;;  %vm311_vm12 = vcmp.eq.s32.totalorder %v258_v28, %v1990_v19  ;;  %2979 = vst [vmem:[#allocation20_spill] sm:$0xff] %v2305_v58  ;;  %vm2995_vm5 = vmmov 1   ;;  %v3012_v57 = vmov 0.0  }
 0x140   :  { %v2281_v35 = vpop.f32.mrb[12].mxu0  ;;  %v2283_v14 = vpop.f32.mrb[12].mxu1  ;;  %vm464_vm14 = vmxor %vm2241_vm0, %vm2896_vm10  ;;  %2976 = vst [vmem:[#allocation19_spill] sm:$0xff] %v2293_v16  ;;  %vm2980_vm0 = vcmp.ge.s32.totalorder %v1990_v19, 16  ;;  %v2322_v6 = vmax.f32 %v687_v10, -1e+30 }
 0x141   :  { %2975 = vst [vmem:[#allocation18_spill] sm:$0xff] %v2283_v14  ;;  %vm2301_vm15 = vmand %vm428_vm3, %vm2233_vm13  ;;  %v695_v28 = vmax.f32 %v2293_v16, -1e+30  ;;  %v185_v30 = vpop.f32.mrb[13].mxu0  ;;  %v2325_v4 = vpop.f32.mrb[13].mxu1  ;;  %vm297_vm13 = vcmp.eq.s32.totalorder %v251_v49, %v1990_v19  ;;  %vm2987_vm3 = vcmp.eq.s32.totalorder %v1993_v21, %v2006_v27 }
 0x142   :  { %vm2311_vm10 = vmor %vm295_vm4, %vm2980_vm0  ;;  %2985 = vst [vmem:[#allocation21_spill] sm:$0xff] %v2322_v6  ;;  %1173 = vmax.xlane.f32.xlu0 %v2305_v58  ;;  %1159 = vmax.xlane.f32.xlu1 %v2322_v6  ;;  %v2415_v21 = vsel %vm2301_vm15, 1.0, %v3012_v57  ;;  %vm3017_vm15 = vnez %v2945_v13 }
 0x143   :  { %vm2318_vm11 = vmand %vm426_vm9, %vm458_vm8  ;;  %2986 = vst [vmem:[#allocation22_spill] sm:$0xff] %v2325_v4  ;;  %v2356_v49 = vsel %vm2311_vm10, -1e+30, %v2281_v35  ;;  %v2368_v50 = vmax.f32 %v695_v28, -1e+30  ;;  %v992_v17 = vmul.f32 %v2415_v21, %v2139_v25  ;;  %v999_v25 = vmul.f32 0.0, %v185_v30 }
 0x144   :  { %vm2331_vm4 = vmand %vm2987_vm3, %vm464_vm14  ;;  %v189_v10 = vpop.f32.mrb[14].mxu0  ;;  %v2342_v16 = vpop.f32.mrb[14].mxu1  ;;  %2998 = vst [vmem:[#allocation25_spill] sm:$0xff] %v2356_v49  ;;  %v688_v58 = vmax.f32 %v2356_v49, -1e+30  ;;  %v2422_v49 = vsel %vm2318_vm11, 1.0, %v3012_v57 }
 0x145   :  { %vm2990_vm9 = vmmov %vm2980_vm0  ;;  %2994 = vst [vmem:[#allocation24_spill] sm:$0xff] %v2342_v16  ;;  %vm313_vm0 = vcmp.eq.s32.totalorder %v259_v59, %v1990_v19  ;;  %v191_v59 = vpop.f32.mrb[15].mxu0  ;;  %v2364_v6 = vpop.f32.mrb[15].mxu1 }
 0x146   :  { %vm2337_vm8 = vmor %vm311_vm12, %vm2990_vm9  ;;  %3002 = vst [vmem:[#allocation26_spill] sm:$0xff] %v2364_v6  ;;  %v389_v6 = vpop.permute.xlu0 %388  ;;  %1175 = vmax.xlane.f32.xlu1 %v2368_v50 }
 0x147   :  { %v2992_v15 = vsel %vm2337_vm8, 4294967295, %v2991_v15  ;;  %vm2349_vm14 = vmxor %vm2191_vm1, %vm2995_vm5  ;;  %vm430_vm1 = vcmp.eq.s32.totalorder %v2219_v2, %v2006_v27  ;;  %3003 = vst [vmem:[#allocation27_spill] sm:$0xff] %v2368_v50  ;;  %v2374_v62 = vsel %vm2337_vm8, -1e+30, %v2283_v14  ;;  %vm436_vm7 = vcmp.eq.s32.totalorder %v389_v6, %v2006_v27  ;;  %v401_v6 = vpop.permute.xlu1 %400 }
 0x148   :  { %2993 = vst [vmem:[#allocation23_spill] sm:$0xff] %v2992_v15  ;;  %vm2999_vm12 = vmmov %vm2990_vm9  ;;  %v2387_v2 = vmax.f32 %v688_v58, -1e+30  ;;  %v696_v28 = vmax.f32 %v2374_v62, -1e+30  ;;  %v993_v50 = vmul.f32 0.0, %v2167_v34 }
 0x149   :  { %vm2360_vm3 = vmor %vm297_vm13, %vm2999_vm12  ;;  %3004 = vst [vmem:[#allocation28_spill] sm:$0xff] %v2374_v62  ;;  %vm434_vm12 = vcmp.eq.s32.totalorder %v386_v23, %v2006_v27  ;;  %v2409_v23 = vsel %vm2331_vm4, 1.0, %v3012_v57 }
 0x14a   :  { %vm3005_vm13 = vmmov %vm2990_vm9  ;;  %3009 = vst [vmem:[#allocation30_spill] sm:$0xff] %v2387_v2  ;;  %v2396_v19 = vsel %vm2360_vm3, -1e+30, %v189_v10  ;;  %1161 = vmax.xlane.f32.xlu0 %v2387_v2  ;;  %v2417_v62 = vmax.f32 %v696_v28, -1e+30  ;;  %v398_v2 = vpop.permute.xlu0 %397  ;;  %v996_v18 = vmul.f32 %v2409_v23, %v2228_v5  ;;  %v990_v5 = vmul.f32 %v2422_v49, %v2107_v11 }
 0x14b   :  { %vm2378_vm9 = vmor %vm313_vm0, %vm3005_vm13  ;;  %3010 = vst [vmem:[#allocation31_spill] sm:$0xff] %v2396_v19  ;;  %v689_v4 = vmax.f32 %v2396_v19, -1e+30  ;;  %v407_v46 = vpop.permute.xlu1 %406  ;;  %v2469_v32 = vadd.f32 %v993_v50, %v992_v17  ;;  %v731_v17 = vsub.f32 -1e+30, %v2101_v8 }
 0x14c   :  { %v3007_v31 = vsel %vm2378_vm9, 4294967295, %v3006_v31  ;;  %vm466_vm6 = vmxor %vm2311_vm10, %vm2995_vm5  ;;  %v2403_v58 = vsel %vm2378_vm9, -1e+30, %v2342_v16  ;;  %3013 = vst [vmem:[#allocation33_spill] sm:$0xff] %v2417_v62 }
 0x14d   :  { %3008 = vst [vmem:[#allocation29_spill] sm:$0xff] %v3007_v31  ;;  %vm468_vm0 = vmxor %vm2360_vm3, %vm2995_vm5  ;;  %v2427_v16 = vmax.f32 %v689_v4, -1e+30  ;;  %v697_v19 = vmax.f32 %v2403_v58, -1e+30  ;;  %v991_v4 = vmul.f32 0.0, %v2126_v20 }
 0x14e   :  { %vm494_vm13 = vmand %vm430_vm1, %vm2349_vm14  ;;  %3011 = vst [vmem:[#allocation32_spill] sm:$0xff] %v2403_v58  ;;  %1177 = vmax.xlane.f32.xlu0 %v2417_v62  ;;  %v995_v58 = vmul.f32 0.0, %v2195_v51  ;;  %v997_v62 = vmul.f32 0.0, %v2261_v45  ;;  %v404_v34 = vpop.permute.xlu0 %403  ;;  %vm3018_vm1 = vnez %v2963_v63  ;;  %v748_v11 = vmul.f32 1.442695, %v731_v17 }
 0x14f   :  { %vm498_vm10 = vmand %vm434_vm12, %vm466_vm6  ;;  %v2425_v1 = vsel %vm494_vm13, 1.0, %v3012_v57  ;;  %3014 = vst [vmem:[#allocation34_spill] sm:$0xff] %v2427_v16  ;;  %1163 = vmax.xlane.f32.xlu1 %v2427_v16  ;;  %v2454_v51 = vmax.f32 %v697_v19, -1e+30  ;;  %v1001_v16 = vmul.f32 0.0, %v191_v59  ;;  %vm446_vm3 = vcmp.eq.s32.totalorder %v404_v34, %v2006_v27 }
 0x150   :  { %vm500_vm14 = vmand %vm436_vm7, %vm468_vm0  ;;  %v2433_v14 = vsel %vm498_vm10, 1.0, %v3012_v57  ;;  %vm444_vm7 = vcmp.eq.s32.totalorder %v401_v6, %v2006_v27  ;;  %v994_v31 = vmul.f32 %v2425_v1, %v2183_v47  ;;  %v2477_v45 = vadd.f32 %v997_v62, %v996_v18 }
 0x151   :  { %v1530_v28 = vsel %vm500_vm14, 1.0, %v3012_v57  ;;  %vm476_vm6 = vmxor %vm2158_vm2, %vm2995_vm5  ;;  %v998_v20 = vmul.f32 %v2433_v14, %v2281_v35  ;;  %vm442_vm2 = vcmp.eq.s32.totalorder %v398_v2, %v2006_v27  ;;  %v2467_v35 = vadd.f32 %v991_v4, %v990_v5 }
 0x152   :  { %v1000_v15 = vmul.f32 %v1530_v28, %v189_v10  ;;  %vm2458_vm11 = vmand %vm444_vm7, %vm476_vm6  ;;  %v2475_v47 = vadd.f32 %v995_v58, %v994_v31  ;;  %vm448_vm0 = vcmp.eq.s32.totalorder %v407_v46, %v2006_v27  ;;  %vm3019_vm13 = vnez %v2973_v44 }
 0x153   :  { %1179 = vmax.xlane.f32.xlu1 %v2454_v51  ;;  %vm474_vm4 = vmxor %vm3017_vm15, %vm2995_vm5  ;;  %v2479_v30 = vadd.f32 %v999_v25, %v998_v20  ;;  %v1534_v62 = vsel %vm2458_vm11, 1.0, %v3012_v57  ;;  %v1007_v46 = vmul.f32 0.0, %v2130_v22  ;;  %v1013_v2 = vmul.f32 0.0, %v2271_v3  ;;  %v364_v22 = vld [vmem:[%s2888_s0 + $0x78] sm:$0xff] }
 0x154   :  { %vm478_vm12 = vmxor %vm3018_vm1, %vm2995_vm5  ;;  %v2485_v13 = vadd.f32 %v1001_v16, %v1000_v15  ;;  %v1009_v16 = vmul.f32 0.0, %v2169_v38  ;;  %v1011_v15 = vmul.f32 0.0, %v2197_v52  ;;  %v1008_v59 = vmul.f32 %v1534_v62, %v2141_v26 }
 0x155   :  { %vm480_vm10 = vmxor %vm3019_vm13, %vm2995_vm5  ;;  %v738_v6 = vsub.f32 -1e+30, %v2077_v55  ;;  %v779_v4 = vsub.f32 %v2085_v60, %v2101_v8  ;;  %v739_v25 = vsub.f32 -1e+30, %v2103_v9  ;;  %v787_v34 = vsub.f32 %v2089_v61, %v2103_v9 }
 0x156   :  { %vm506_vm14 = vmand %vm442_vm2, %vm474_vm4  ;;  %v2511_v52 = vadd.f32 %v1009_v16, %v1008_v59  ;;  %v780_v60 = vsub.f32 %v2137_v24, %v2173_v40  ;;  %v788_v61 = vsub.f32 %v2147_v29, %v2213_v0  ;;  %v781_v24 = vsub.f32 %v2165_v33, %v2199_v56  ;;  %v3026_v29 = vld [vmem:[#allocation13_spill] sm:$0xff] }
 0x157   :  { %vm510_vm7 = vmand %vm446_vm3, %vm478_vm12  ;;  %v1533_v63 = vsel %vm506_vm14, 1.0, %v3012_v57  ;;  %v762_v5 = vmul.f32 1.442695, %v738_v6  ;;  %vm1501_vm4 = vcmask 7168  }
 0x158   :  { %vm512_vm6 = vmand %vm448_vm0, %vm480_vm10  ;;  %v1535_v31 = vsel %vm510_vm7, 1.0, %v3012_v57  ;;  %v1006_v44 = vmul.f32 %v1533_v63, %v2109_v12  ;;  %v363_v12 = vld [vmem:[%s2888_s0 + $0x70] sm:$0xff]  ;;  %3022 = vst [vmem:[#allocation37_spill] sm:$0xff] %v2511_v52  ;;  %v798_v59 = vmul.f32 1.442695, %v780_v60 }
 0x159   :  { %v1536_v10 = vsel %vm512_vm6, 1.0, %v3012_v57  ;;  %v1010_v50 = vmul.f32 %v1535_v31, %v2185_v48  ;;  %vm2602_vm11 = vmxor %vm2337_vm8, %vm2995_vm5 }
 0x15a   :  { %v1012_v19 = vmul.f32 %v1536_v10, %v2251_v39  ;;  %v2501_v58 = vadd.f32 %v1007_v46, %v1006_v44  ;;  %v812_v46 = vmul.f32 1.442695, %v787_v34  ;;  %vm2613_vm2 = vmxor %vm2378_vm9, %vm2995_vm5 }
 0x15b   :  { %v2509_v38 = vadd.f32 %v1011_v15, %v1010_v50  ;;  %v733_v15 = vsub.f32 -1e+30, %v2199_v56 }
 0x15c   :  { %3020 = vst [vmem:[#allocation35_spill] sm:$0xff] %v2501_v58  ;;  %v2513_v26 = vadd.f32 %v1013_v2, %v1012_v19  ;;  %v741_v2 = vsub.f32 -1e+30, %v2237_v7 }
 0x15d   :  { %3021 = vst [vmem:[#allocation36_spill] sm:$0xff] %v2509_v38 }
 0x15e   :  { %3023 = vst [vmem:[#allocation38_spill] sm:$0xff] %v2513_v26 }
 0x164   :  { %412 = vperm.xlu1 %1658, %v364_v22   ;;  %409 = vperm.xlu0 %1657, %v363_v12   ;;  %v814_v22 = vmul.f32 1.442695, %v788_v61  ;;  %v789_v12 = vsub.f32 %v3026_v29, %v2237_v7  ;;  %v3032_v61 = vld [vmem:[#allocation15_spill] sm:$0xff] }
 0x183   :  { %1407 = vadd.xlane.f32.xlu0 %v2057_v41 }
 0x187   :  { %1411 = vadd.xlane.f32.xlu0 %v2415_v21 }
 0x188   :  { %1405 = vadd.xlane.f32.xlu1 %v2050_v36 }
 0x18b   :  { %1415 = vadd.xlane.f32.xlu0 %v2409_v23  ;;  %v778_v23 = vsub.f32 %v2061_v42, %v2075_v54 }
 0x18c   :  { %1409 = vadd.xlane.f32.xlu1 %v2422_v49 }
 0x18f   :  { %1419 = vadd.xlane.f32.xlu0 %v1530_v28  ;;  %v794_v28 = vmul.f32 1.442695, %v778_v23  ;;  %v3027_v23 = vld [vmem:[#allocation16_spill] sm:$0xff] }
 0x190   :  { %1413 = vadd.xlane.f32.xlu1 %v2425_v1  ;;  %v786_v1 = vsub.f32 %v2065_v43, %v2077_v55  ;;  %v732_v43 = vsub.f32 -1e+30, %v2173_v40  ;;  %v734_v6 = vsub.f32 -1e+30, %v3027_v23 }
 0x192   :  { %v810_v42 = vmul.f32 1.442695, %v786_v1  ;;  %v750_v16 = vmul.f32 1.442695, %v732_v43  ;;  %v800_v1 = vmul.f32 1.442695, %v781_v24 }
 0x193   :  { %1423 = vadd.xlane.f32.xlu0 %v2073_v53  ;;  %v754_v43 = vmul.f32 1.442695, %v734_v6  ;;  %v3033_v24 = vld [vmem:[#allocation21_spill] sm:$0xff] }
 0x194   :  { %1417 = vadd.xlane.f32.xlu1 %v2433_v14  ;;  %v730_v14 = vsub.f32 -1e+30, %v2075_v54 }
 0x196   :  { %v746_v18 = vmul.f32 1.442695, %v730_v14  ;;  %v752_v14 = vmul.f32 1.442695, %v733_v15 }
 0x197   :  { %1427 = vadd.xlane.f32.xlu0 %v1534_v62  ;;  %v796_v62 = vmul.f32 1.442695, %v779_v4  ;;  %v768_v4 = vmul.f32 1.442695, %v741_v2 }
 0x198   :  { %1421 = vadd.xlane.f32.xlu1 %v2053_v37  ;;  %1659 = vpow2.f32 %v746_v18  ;;  %v3028_v18 = vld [vmem:[#allocation14_spill] sm:$0xff] }
 0x199   :  { %1661 = vpow2.f32 %v794_v28  ;;  %v782_v33 = vsub.f32 %v3028_v18, %v3027_v23  ;;  %v3046_v18 = vld [vmem:[#allocation24_spill] sm:$0xff] }
 0x19a   :  { %1663 = vpow2.f32 %v762_v5 }
 0x19b   :  { %1431 = vadd.xlane.f32.xlu0 %v1536_v10  ;;  %v740_v10 = vsub.f32 -1e+30, %v2213_v0  ;;  %1665 = vpow2.f32 %v810_v42  ;;  %v3030_v42 = vld [vmem:[#allocation20_spill] sm:$0xff] }
 0x19c   :  { %1425 = vadd.xlane.f32.xlu1 %v1533_v63  ;;  %1667 = vpow2.f32 %v748_v11  ;;  %v742_v34 = vsub.f32 -1e+30, %v3030_v42 }
 0x19d   :  { %1669 = vpow2.f32 %v796_v62  ;;  %v766_v50 = vmul.f32 1.442695, %v740_v10 }
 0x1a0   :  { %1429 = vadd.xlane.f32.xlu1 %v1535_v31  ;;  %v764_v31 = vmul.f32 1.442695, %v739_v25  ;;  %v816_v25 = vmul.f32 1.442695, %v789_v12  ;;  %v3037_v12 = vld [vmem:[#allocation17_spill] sm:$0xff] }
 0x1a2   :  { %1671 = vpow2.f32 %v764_v31  ;;  %v2579_v28 = vpop.eup %1659  ;;  %v802_v31 = vmul.f32 1.442695, %v782_v33 }
 0x1a3   :  { %1673 = vpow2.f32 %v812_v46  ;;  %v2581_v5 = vpop.eup %1661 }
 0x1a4   :  { %1675 = vpow2.f32 %v750_v16  ;;  %v2584_v11 = vpop.eup %1663  ;;  %v790_v16 = vsub.f32 %v3032_v61, %v3030_v42  ;;  %v3041_v61 = vld [vmem:[#allocation27_spill] sm:$0xff] }
 0x1a5   :  { %1677 = vpow2.f32 %v798_v59  ;;  %v2588_v60 = vpop.eup %1665  ;;  %v770_v59 = vmul.f32 1.442695, %v742_v34  ;;  %v743_v2 = vsub.f32 -1e+30, %v3041_v61 }
 0x1a6   :  { %1679 = vpow2.f32 %v766_v50  ;;  %v2592_v46 = vpop.eup %1667  ;;  %v735_v50 = vsub.f32 -1e+30, %v3033_v24 }
 0x1a7   :  { %1681 = vpow2.f32 %v814_v22  ;;  %v2596_v15 = vpop.eup %1669 }
 0x1a8   :  { %1683 = vpow2.f32 %v752_v14  ;;  %v783_v14 = vsub.f32 %v3037_v12, %v3033_v24 }
 0x1a9   :  { %1685 = vpow2.f32 %v800_v1 }
 0x1aa   :  { %1687 = vpow2.f32 %v768_v4 }
 0x1ab   :  { %1689 = vpow2.f32 %v816_v25 }
 0x1ac   :  { %v2606_v29 = vpop.eup %1671  ;;  %1691 = vpow2.f32 %v754_v43  ;;  %v818_v43 = vmul.f32 1.442695, %v790_v16 }
 0x1ad   :  { %v2617_v33 = vpop.eup %1673  ;;  %1693 = vpow2.f32 %v802_v31 }
 0x1ae   :  { %v2622_v34 = vpop.eup %1675  ;;  %1695 = vpow2.f32 %v770_v59 }
 0x1af   :  { %v2630_v31 = vpop.eup %1677  ;;  %1697 = vpow2.f32 %v818_v43  ;;  %v3048_v43 = vld [vmem:[#allocation25_spill] sm:$0xff] }
 0x1b0   :  { %v2637_v16 = vpop.eup %1679 }
 0x1b1   :  { %v2642_v59 = vpop.eup %1681 }
 0x1bb   :  { %v2524_v41 = vpop.xlane.xlu0 %1165  ;;  %v2526_v36 = vpop.xlane.xlu1 %1149 }
 0x1bc   :  { %3024 = vst [vmem:[#allocation39_spill] sm:$0xff] %v2524_v41  ;;  %3025 = vst [vmem:[#allocation40_spill] sm:$0xff] %v2526_v36  ;;  %v1205_v4 = vsub.f32 %v2077_v55, %v2524_v41  ;;  %v1197_v12 = vsub.f32 %v2075_v54, %v2526_v36  ;;  %v756_v55 = vmul.f32 1.442695, %v735_v50  ;;  %v804_v54 = vmul.f32 1.442695, %v783_v14 }
 0x1bd   :  { %v3043_v36 = vld [vmem:[#allocation22_spill] sm:$0xff] }
 0x1be   :  { %v3045_v50 = vld [vmem:[#allocation26_spill] sm:$0xff]  ;;  %1699 = vpow2.f32 %v756_v55  ;;  %v3050_v55 = vld [vmem:[#allocation11_spill] sm:$0xff] }
 0x1bf   :  { %v2528_v48 = vpop.xlane.xlu0 %1151  ;;  %v2530_v39 = vpop.xlane.xlu1 %1167  ;;  %v1017_v52 = vmul.f32 0.0, %v3045_v50  ;;  %1701 = vpow2.f32 %v804_v54 }
 0x1c0   :  { %v1198_v38 = vsub.f32 %v2101_v8, %v2528_v48 }
 0x1c3   :  { %v2532_v3 = vpop.xlane.xlu0 %1153 }
 0x1c7   :  { %v2534_v49 = vpop.xlane.xlu1 %1155  ;;  %v2536_v53 = vpop.xlane.xlu0 %1169 }
 0x1cb   :  { %v2539_v37 = vpop.xlane.xlu1 %1171  ;;  %v2544_v21 = vpop.xlane.xlu0 %1157 }
 0x1cf   :  { %v2552_v20 = vpop.xlane.xlu1 %1159  ;;  %v2557_v63 = vpop.xlane.xlu0 %1173 }
 0x1d3   :  { %v2564_v44 = vpop.xlane.xlu1 %1175 }
 0x1d7   :  { %v2570_v19 = vpop.xlane.xlu0 %1161 }
 0x1db   :  { %v2586_v62 = vpop.xlane.xlu0 %1177 }
 0x1dc   :  { %v2577_v17 = vpop.xlane.xlu1 %1163 }
 0x1dd   :  { %3029 = vst [vmem:[#allocation13_spill] sm:$0xff] %v2577_v17 }
 0x1e0   :  { %v2590_v10 = vpop.xlane.xlu1 %1179 }
 0x1e1   :  { %3031 = vst [vmem:[#allocation16_spill] sm:$0xff] %v2590_v10  ;;  %v2648_v10 = vpop.eup %1683 }
 0x1e3   :  { %v410_v6 = vpop.permute.xlu0 %409 }
 0x1e4   :  { %vm450_vm8 = vcmp.eq.s32.totalorder %v410_v6, %v2006_v27  ;;  %v413_v25 = vpop.permute.xlu1 %412  ;;  %v3042_v6 = vld [vmem:[#allocation19_spill] sm:$0xff] }
 0x1e5   :  { %vm452_vm5 = vcmp.eq.s32.totalorder %v413_v25, %v2006_v27  ;;  %vm514_vm9 = vmand %vm450_vm8, %vm2602_vm11  ;;  %v791_v1 = vsub.f32 %v3042_v6, %v3041_v61  ;;  %v1015_v27 = vmul.f32 0.0, %v3043_v36  ;;  %v3044_v25 = vld [vmem:[#allocation18_spill] sm:$0xff]  ;;  %v1229_v6 = vmul.f32 1.442695, %v1205_v4 }
 0x1e6   :  { %v1537_v41 = vsel %vm514_vm9, 1.0, %v3012_v57  ;;  %vm516_vm15 = vmand %vm452_vm5, %vm2613_vm2  ;;  %v1213_v36 = vmul.f32 1.442695, %v1197_v12  ;;  %v3047_v4 = vld [vmem:[#allocation30_spill] sm:$0xff] }
 0x1e7   :  { %v1014_v22 = vmul.f32 %v1537_v41, %v3044_v25  ;;  %1433 = vadd.xlane.f32.xlu1 %v1537_v41  ;;  %v1538_v26 = vsel %vm516_vm15, 1.0, %v3012_v57  ;;  %v1206_v41 = vsub.f32 %v2103_v9, %v2530_v39  ;;  %v2654_v57 = vpop.eup %1685  ;;  %v772_v25 = vmul.f32 1.442695, %v743_v2 }
 0x1e8   :  { %1435 = vadd.xlane.f32.xlu0 %v1538_v26  ;;  %v1016_v58 = vmul.f32 %v1538_v26, %v3046_v18  ;;  %v736_v50 = vsub.f32 -1e+30, %v3047_v4  ;;  %v2659_v8 = vpop.eup %1687  ;;  %v820_v26 = vmul.f32 1.442695, %v791_v1  ;;  %v784_v12 = vsub.f32 %v3048_v43, %v3047_v4  ;;  %v3049_v18 = vld [vmem:[#allocation9_spill] sm:$0xff] }
 0x1e9   :  { %v2652_v14 = vadd.f32 %v1015_v27, %v1014_v22  ;;  %v2664_v9 = vpop.eup %1689  ;;  %1703 = vpow2.f32 %v1229_v6  ;;  %v1215_v27 = vmul.f32 1.442695, %v1198_v38  ;;  %v1207_v2 = vsub.f32 %v2213_v0, %v2536_v53  ;;  %v3051_v43 = vld [vmem:[#allocation33_spill] sm:$0xff] }
 0x1ea   :  { %v2657_v17 = vadd.f32 %v1017_v52, %v1016_v58  ;;  %v2669_v58 = vpop.eup %1691  ;;  %1705 = vpow2.f32 %v1213_v36  ;;  %v1231_v52 = vmul.f32 1.442695, %v1206_v41  ;;  %v1199_v1 = vsub.f32 %v2173_v40, %v2532_v3  ;;  %v3052_v40 = vld [vmem:[#allocation28_spill] sm:$0xff] }
 0x1eb   :  { %1357 = vadd.xlane.f32.xlu1 %v3049_v18  ;;  %v2673_v54 = vpop.eup %1693  ;;  %1707 = vpow2.f32 %v772_v25  ;;  %v758_v22 = vmul.f32 1.442695, %v736_v50  ;;  %v744_v18 = vsub.f32 -1e+30, %v3051_v43  ;;  %v806_v38 = vmul.f32 1.442695, %v784_v12 }
 0x1ec   :  { %1359 = vadd.xlane.f32.xlu0 %v3050_v55  ;;  %1709 = vpow2.f32 %v820_v26  ;;  %v2677_v0 = vpop.eup %1695  ;;  %v1233_v6 = vmul.f32 1.442695, %v1207_v2  ;;  %v1201_v36 = vsub.f32 %v3027_v23, %v2544_v21  ;;  %v792_v41 = vsub.f32 %v3052_v40, %v3051_v43 }
 0x1ed   :  { %1711 = vpow2.f32 %v1215_v27  ;;  %v1217_v25 = vmul.f32 1.442695, %v1199_v1  ;;  %v1200_v50 = vsub.f32 %v2199_v56, %v2534_v49  ;;  %v774_v26 = vmul.f32 1.442695, %v744_v18  ;;  %v3053_v1 = vld [vmem:[#allocation34_spill] sm:$0xff]  ;;  %v3054_v18 = vld [vmem:[#allocation31_spill] sm:$0xff] }
 0x1ee   :  { %1713 = vpow2.f32 %v1231_v52  ;;  %v882_v23 = vadd.f32 %v2588_v60, %v2584_v11  ;;  %v874_v12 = vadd.f32 %v2581_v5, %v2579_v28  ;;  %v1221_v2 = vmul.f32 1.442695, %v1201_v36 }
 0x1ef   :  { %1361 = vadd.xlane.f32.xlu1 %v2467_v35  ;;  %1715 = vpow2.f32 %v758_v22  ;;  %v2686_v35 = vpop.eup %1697  ;;  %v1209_v56 = vsub.f32 %v3030_v42, %v2557_v63  ;;  %v906_v55 = vmul.f32 0.0, %v2579_v28  ;;  %v822_v52 = vmul.f32 1.442695, %v792_v41 }
 0x1f0   :  { %1363 = vadd.xlane.f32.xlu0 %v2469_v32  ;;  %1717 = vpow2.f32 %v806_v38  ;;  %v914_v32 = vmul.f32 0.0, %v2584_v11  ;;  %v2694_v27 = vpop.eup %1699  ;;  %v1219_v60 = vmul.f32 1.442695, %v1200_v50  ;;  %v1208_v11 = vsub.f32 %v2237_v7, %v2539_v37 }
 0x1f1   :  { %1719 = vpow2.f32 %v1233_v6  ;;  %v737_v22 = vsub.f32 -1e+30, %v3053_v1  ;;  %v785_v38 = vsub.f32 %v3054_v18, %v3053_v1  ;;  %v745_v42 = vsub.f32 -1e+30, %v2454_v51 }
 0x1f2   :  { %1721 = vpow2.f32 %v1217_v25  ;;  %v930_v6 = vadd.f32 %v914_v32, %v882_v23  ;;  %v907_v36 = vmul.f32 0.0, %v2592_v46  ;;  %v883_v7 = vadd.f32 %v2617_v33, %v2606_v29 }
 0x1f3   :  { %1365 = vadd.xlane.f32.xlu1 %v2475_v47  ;;  %v2700_v47 = vpop.eup %1701  ;;  %v915_v40 = vmul.f32 0.0, %v2606_v29  ;;  %1723 = vpow2.f32 %v1221_v2  ;;  %v1237_v25 = vmul.f32 1.442695, %v1209_v56  ;;  %v1203_v50 = vsub.f32 %v3047_v4, %v2570_v19  ;;  %v3055_v29 = vld [vmem:[#allocation32_spill] sm:$0xff] }
 0x1f4   :  { %1367 = vadd.xlane.f32.xlu0 %v2477_v45  ;;  %v1704_v5 = vpop.eup %1703  ;;  %v875_v45 = vadd.f32 %v2596_v15, %v2592_v46  ;;  %v922_v15 = vadd.f32 %v906_v55, %v874_v12  ;;  %1725 = vpow2.f32 %v1219_v60  ;;  %v1202_v46 = vsub.f32 %v3033_v24, %v2552_v20 }
 0x1f5   :  { %v1706_v28 = vpop.eup %1705  ;;  %v1253_v33 = vmul.f32 %v1704_v5, %v930_v6  ;;  %1727 = vpow2.f32 %v774_v26  ;;  %v793_v32 = vsub.f32 %v3055_v29, %v2454_v51  ;;  %v884_v4 = vadd.f32 %v2642_v59, %v2637_v16 }
 0x1f6   :  { %v2715_v41 = vpop.eup %1707  ;;  %v1245_v2 = vmul.f32 %v1706_v28, %v922_v15  ;;  %v931_v12 = vadd.f32 %v915_v40, %v883_v7  ;;  %v916_v55 = vmul.f32 0.0, %v2637_v16  ;;  %v876_v60 = vadd.f32 %v2630_v31, %v2622_v34 }
 0x1f7   :  { %1369 = vadd.xlane.f32.xlu1 %v2479_v30  ;;  %v2720_v18 = vpop.eup %1709  ;;  %v1235_v30 = vmul.f32 1.442695, %v1208_v11  ;;  %1729 = vpow2.f32 %v1237_v25  ;;  %v1225_v11 = vmul.f32 1.442695, %v1203_v50  ;;  %v1211_v26 = vsub.f32 %v3051_v43, %v2586_v62 }
 0x1f8   :  { %1371 = vadd.xlane.f32.xlu0 %v2485_v13  ;;  %v1712_v23 = vpop.eup %1711  ;;  %v923_v13 = vadd.f32 %v907_v36, %v875_v45  ;;  %v908_v5 = vmul.f32 0.0, %v2622_v34  ;;  %v1223_v59 = vmul.f32 1.442695, %v1202_v46  ;;  %v1210_v45 = vsub.f32 %v3041_v61, %v2564_v44 }
 0x1f9   :  { %v1714_v56 = vpop.eup %1713  ;;  %1731 = vpow2.f32 %v1235_v30  ;;  %v760_v36 = vmul.f32 1.442695, %v737_v22  ;;  %v808_v31 = vmul.f32 1.442695, %v785_v38  ;;  %v932_v25 = vadd.f32 %v916_v55, %v884_v4  ;;  %v3056_v38 = vld [vmem:[#allocation13_spill] sm:$0xff] }
 0x1fa   :  { %v1716_v24 = vpop.eup %1715  ;;  %v1246_v6 = vmul.f32 %v1712_v23, %v923_v13  ;;  %1733 = vpow2.f32 %v822_v52  ;;  %v1254_v7 = vmul.f32 %v1714_v56, %v931_v12  ;;  %v878_v43 = vadd.f32 %v2673_v54, %v2669_v58  ;;  %v3057_v13 = vld [vmem:[#allocation16_spill] sm:$0xff] }
 0x1fb   :  { %1277 = vadd.xlane.f32.xlu1 %v1253_v33  ;;  %v1718_v28 = vpop.eup %1717  ;;  %v910_v34 = vmul.f32 0.0, %v2669_v58  ;;  %v877_v50 = vadd.f32 %v2654_v57, %v2648_v10  ;;  %1735 = vpow2.f32 %v1225_v11  ;;  %v1241_v15 = vmul.f32 1.442695, %v1211_v26 }
 0x1fc   :  { %1261 = vadd.xlane.f32.xlu0 %v1245_v2  ;;  %v1720_v16 = vpop.eup %1719  ;;  %v924_v61 = vadd.f32 %v908_v5, %v876_v60  ;;  %v909_v52 = vmul.f32 0.0, %v2648_v10  ;;  %1737 = vpow2.f32 %v1223_v59  ;;  %v1239_v22 = vmul.f32 1.442695, %v1210_v45 }
 0x1fd   :  { %v1722_v40 = vpop.eup %1721  ;;  %v1204_v30 = vsub.f32 %v3053_v1, %v3056_v38  ;;  %v1255_v46 = vmul.f32 %v1720_v16, %v932_v25  ;;  %1739 = vpow2.f32 %v760_v36  ;;  %v776_v54 = vmul.f32 1.442695, %v745_v42 }
 0x1fe   :  { %v1724_v33 = vpop.eup %1723  ;;  %v824_v23 = vmul.f32 1.442695, %v793_v32  ;;  %v1247_v58 = vmul.f32 %v1722_v40, %v924_v61  ;;  %1741 = vpow2.f32 %v808_v31  ;;  %v926_v57 = vadd.f32 %v910_v34, %v878_v43 }
 0x1ff   :  { %1263 = vadd.xlane.f32.xlu1 %v1246_v6  ;;  %v1726_v29 = vpop.eup %1725  ;;  %v886_v2 = vadd.f32 %v2686_v35, %v2677_v0  ;;  %v918_v10 = vmul.f32 0.0, %v2677_v0  ;;  %1743 = vpow2.f32 %v1241_v15  ;;  %v925_v56 = vadd.f32 %v909_v52, %v877_v50 }
 0x200   :  { %1279 = vadd.xlane.f32.xlu0 %v1254_v7  ;;  %v1728_v4 = vpop.eup %1727  ;;  %v885_v1 = vadd.f32 %v2664_v9, %v2659_v8  ;;  %v917_v42 = vmul.f32 0.0, %v2659_v8  ;;  %1745 = vpow2.f32 %v1239_v22  ;;  %v1227_v32 = vmul.f32 1.442695, %v1204_v30 }
 0x201   :  { %v1212_v12 = vsub.f32 %v2454_v51, %v3057_v13  ;;  %v1249_v55 = vmul.f32 %v1724_v33, %v926_v57  ;;  %v1730_v60 = vpop.eup %1729  ;;  %1747 = vpow2.f32 %v776_v54  ;;  %v1248_v35 = vmul.f32 %v1726_v29, %v925_v56 }
 0x202   :  { %1749 = vpow2.f32 %v824_v23  ;;  %v934_v0 = vadd.f32 %v918_v10, %v886_v2  ;;  %v880_v26 = vadd.f32 %v1718_v28, %v1716_v24  ;;  %v912_v5 = vmul.f32 0.0, %v1716_v24 }
 0x203   :  { %1281 = vadd.xlane.f32.xlu1 %v1255_v46  ;;  %v1732_v11 = vpop.eup %1731  ;;  %v933_v9 = vadd.f32 %v917_v42, %v885_v1  ;;  %v879_v8 = vadd.f32 %v2700_v47, %v2694_v27  ;;  %v911_v45 = vmul.f32 0.0, %v2694_v27  ;;  %1751 = vpow2.f32 %v1227_v32  ;;  %v3059_v42 = vld [vmem:[#allocation35_spill] sm:$0xff]  ;;  %v3060_v32 = vld [vmem:[#allocation36_spill] sm:$0xff] }
 0x204   :  { %1265 = vadd.xlane.f32.xlu0 %v1247_v58  ;;  %v1734_v59 = vpop.eup %1733  ;;  %v1243_v51 = vmul.f32 1.442695, %v1212_v12  ;;  %v1257_v6 = vmul.f32 %v1730_v60, %v934_v0  ;;  %v928_v7 = vadd.f32 %v912_v5, %v880_v26  ;;  %v920_v25 = vmul.f32 0.0, %v1728_v4  ;;  %v3061_v12 = vld [vmem:[#allocation12_spill] sm:$0xff]  ;;  %v3063_v60 = vld [vmem:[#allocation38_spill] sm:$0xff] }
 0x205   :  { %v1736_v16 = vpop.eup %1735  ;;  %v1256_v36 = vmul.f32 %v1732_v11, %v933_v9  ;;  %v888_v40 = vadd.f32 %v1734_v59, %v1728_v4  ;;  %v927_v24 = vadd.f32 %v911_v45, %v879_v8  ;;  %v887_v43 = vadd.f32 %v2720_v18, %v2715_v41  ;;  %v3058_v4 = vld [vmem:[#allocation10_spill] sm:$0xff] }
 0x206   :  { %v1738_v31 = vpop.eup %1737  ;;  %v919_v47 = vmul.f32 0.0, %v2715_v41  ;;  %1753 = vpow2.f32 %v1243_v51  ;;  %v1251_v27 = vmul.f32 %v1736_v16, %v928_v7 }
 0x207   :  { %1269 = vadd.xlane.f32.xlu1 %v1249_v55  ;;  %v1740_v28 = vpop.eup %1739  ;;  %v1250_v15 = vmul.f32 %v1738_v31, %v927_v24  ;;  %v936_v52 = vadd.f32 %v920_v25, %v888_v40  ;;  %v3062_v55 = vld [vmem:[#allocation37_spill] sm:$0xff] }
 0x208   :  { %1267 = vadd.xlane.f32.xlu0 %v1248_v35  ;;  %v1742_v34 = vpop.eup %1741  ;;  %v935_v30 = vadd.f32 %v919_v47, %v887_v43  ;;  %v913_v33 = vmul.f32 0.0, %v1740_v28 }
 0x209   :  { %v1744_v50 = vpop.eup %1743  ;;  %v881_v46 = vadd.f32 %v1742_v34, %v1740_v28 }
 0x20a   :  { %v1746_v61 = vpop.eup %1745  ;;  %v1259_v23 = vmul.f32 %v1744_v50, %v936_v52 }
 0x20b   :  { %1285 = vadd.xlane.f32.xlu1 %v1257_v6  ;;  %v1748_v22 = vpop.eup %1747  ;;  %v1258_v58 = vmul.f32 %v1746_v61, %v935_v30  ;;  %v929_v41 = vadd.f32 %v913_v33, %v881_v46 }
 0x20c   :  { %1283 = vadd.xlane.f32.xlu0 %v1256_v36  ;;  %v1750_v54 = vpop.eup %1749  ;;  %v921_v57 = vmul.f32 0.0, %v1748_v22 }
 0x20d   :  { %v1752_v29 = vpop.eup %1751  ;;  %v889_v18 = vadd.f32 %v1750_v54, %v1748_v22 }
 0x20e   :  { %v1252_v2 = vmul.f32 %v1752_v29, %v929_v41  ;;  %v3064_v41 = vld [vmem:[#allocation40_spill] sm:$0xff] }
 0x20f   :  { %1273 = vadd.xlane.f32.xlu1 %v1251_v27  ;;  %v937_v56 = vadd.f32 %v921_v57, %v889_v18 }
 0x210   :  { %1271 = vadd.xlane.f32.xlu0 %v1250_v15  ;;  %v1754_v10 = vpop.eup %1753  ;;  %v1408_v11 = vpop.xlane.xlu0 %1407 }
 0x211   :  { %v1260_v1 = vmul.f32 %v1754_v10, %v937_v56 }
 0x213   :  { %1289 = vadd.xlane.f32.xlu1 %v1259_v23 }
 0x214   :  { %1287 = vadd.xlane.f32.xlu0 %v1258_v58  ;;  %v1412_v26 = vpop.xlane.xlu0 %1411 }
 0x215   :  { %v1406_v35 = vpop.xlane.xlu1 %1405 }
 0x217   :  { %1373 = vadd.xlane.f32.xlu1 %v3058_v4 }
 0x218   :  { %1275 = vadd.xlane.f32.xlu0 %v1252_v2  ;;  %v1416_v59 = vpop.xlane.xlu0 %1415 }
 0x219   :  { %v1410_v0 = vpop.xlane.xlu1 %1409 }
 0x21b   :  { %1377 = vadd.xlane.f32.xlu1 %v3059_v42 }
 0x21c   :  { %1291 = vadd.xlane.f32.xlu0 %v1260_v1  ;;  %v2768_v8 = vpop.xlane.xlu0 %1419 }
 0x21d   :  { %v1414_v5 = vpop.xlane.xlu1 %1413 }
 0x21f   :  { %1381 = vadd.xlane.f32.xlu1 %v3060_v32 }
 0x220   :  { %1375 = vadd.xlane.f32.xlu0 %v3061_v12  ;;  %v2770_v51 = vpop.xlane.xlu0 %1423 }
 0x221   :  { %v2766_v9 = vpop.xlane.xlu1 %1417 }
 0x223   :  { %1385 = vadd.xlane.f32.xlu1 %v2652_v14 }
 0x224   :  { %1379 = vadd.xlane.f32.xlu0 %v3062_v55  ;;  %v2772_v6 = vpop.xlane.xlu0 %1427 }
 0x225   :  { %v1422_v45 = vpop.xlane.xlu1 %1421 }
 0x228   :  { %1383 = vadd.xlane.f32.xlu0 %v3063_v60  ;;  %v2776_v36 = vpop.xlane.xlu0 %1431 }
 0x229   :  { %v1426_v14 = vpop.xlane.xlu1 %1425 }
 0x22c   :  { %1387 = vadd.xlane.f32.xlu0 %v2657_v17 }
 0x22d   :  { %v2774_v16 = vpop.xlane.xlu1 %1429 }
 0x274   :  { %v2778_v17 = vpop.xlane.xlu1 %1433 }
 0x275   :  { %v2780_v31 = vpop.xlane.xlu0 %1435 }
 0x278   :  { %v1358_v7 = vpop.xlane.xlu1 %1357 }
 0x279   :  { %v1360_v40 = vpop.xlane.xlu0 %1359 }
 0x27c   :  { %v1362_v25 = vpop.xlane.xlu1 %1361 }
 0x27d   :  { %v2782_v28 = vpop.xlane.xlu0 %1363 }
 0x280   :  { %v2784_v24 = vpop.xlane.xlu1 %1365 }
 0x281   :  { %v2786_v43 = vpop.xlane.xlu0 %1367 }
 0x284   :  { %v2788_v47 = vpop.xlane.xlu1 %1369 }
 0x285   :  { %v2790_v34 = vpop.xlane.xlu0 %1371 }
 0x288   :  { %v1278_v27 = vpop.xlane.xlu1 %1277 }
 0x289   :  { %v1262_v50 = vpop.xlane.xlu0 %1261 }
 0x28a   :  { %1755 = vlog2.f32 %v1262_v50 }
 0x28b   :  { %1757 = vrcp.f32 %v1406_v35 }
 0x28c   :  { %v1264_v15 = vpop.xlane.xlu1 %1263 }
 0x28d   :  { %1759 = vlog2.f32 %v1264_v15  ;;  %v1280_v61 = vpop.xlane.xlu0 %1279 }
 0x28e   :  { %1761 = vrcp.f32 %v1408_v11 }
 0x28f   :  { %1763 = vrcp.f32 %v1412_v26 }
 0x290   :  { %v1282_v52 = vpop.xlane.xlu1 %1281  ;;  %1765 = vrcp.f32 %v1416_v59 }
 0x291   :  { %v1266_v22 = vpop.xlane.xlu0 %1265 }
 0x292   :  { %1767 = vlog2.f32 %v1266_v22 }
 0x293   :  { %1769 = vlog2.f32 %v1278_v27 }
 0x294   :  { %v1756_v30 = vpop.eup %1755  ;;  %1771 = vrcp.f32 %v1410_v0  ;;  %v1270_v46 = vpop.xlane.xlu1 %1269 }
 0x295   :  { %v1294_v33 = vmul.f32 0.6931472, %v1756_v30  ;;  %1773 = vlog2.f32 %v1270_v46  ;;  %v1268_v54 = vpop.xlane.xlu0 %1267  ;;  %v1758_v23 = vpop.eup %1757 }
 0x296   :  { %1775 = vlog2.f32 %v1268_v54  ;;  %v1438_v29 = vmul.f32 %v1758_v23, %v1358_v7 }
 0x297   :  { %v1760_v58 = vpop.eup %1759  ;;  %1777 = vrcp.f32 %v1414_v5  ;;  %v1325_v18 = vadd.f32 %v1294_v33, %v3064_v41  ;;  %v3065_v41 = vld [vmem:[#allocation39_spill] sm:$0xff] }
 0x298   :  { %v1296_v57 = vmul.f32 0.6931472, %v1760_v58  ;;  %1779 = vlog2.f32 %v1282_v52  ;;  %v1286_v2 = vpop.xlane.xlu1 %1285  ;;  %v1762_v10 = vpop.eup %1761 }
 0x299   :  { %1781 = vrcp.f32 %v1422_v45  ;;  %v1469_v4 = vsub.f32 %v1438_v29, %v1325_v18  ;;  %v1284_v56 = vpop.xlane.xlu0 %1283  ;;  %v1764_v1 = vpop.eup %1763  ;;  %v1440_v42 = vmul.f32 %v1762_v10, %v1360_v40 }
 0x29a   :  { %1783 = vrcp.f32 %v1426_v14  ;;  %v1326_v32 = vadd.f32 %v1296_v57, %v2528_v48  ;;  %v2794_v12 = vpop.eup %1765  ;;  %v1444_v33 = vmul.f32 %v1764_v1, %v2782_v28 }
 0x29b   :  { %v1485_v55 = vmul.f32 -1.0, %v1469_v4  ;;  %1785 = vlog2.f32 %v1286_v2 }
 0x29c   :  { %v1768_v60 = vpop.eup %1767  ;;  %v1470_v35 = vsub.f32 %v1440_v42, %v1326_v32  ;;  %1787 = vlog2.f32 %v1280_v61  ;;  %v1274_v11 = vpop.xlane.xlu1 %1273 }
 0x29d   :  { %v1770_v0 = vpop.eup %1769  ;;  %1502 = vst.msk [vmem:[%s2892_s4] sm:$0xff] %vm1501_vm4, %v1485_v55  ;;  %v1298_v26 = vmul.f32 0.6931472, %v1768_v60  ;;  %1789 = vlog2.f32 %v1274_v11  ;;  %v1272_v5 = vpop.xlane.xlu0 %1271 }
 0x29e   :  { %v1772_v59 = vpop.eup %1771  ;;  %v1486_v45 = vmul.f32 -1.0, %v1470_v35  ;;  %1791 = vlog2.f32 %v1272_v5  ;;  %v1310_v27 = vmul.f32 0.6931472, %v1770_v0 }
 0x29f   :  { %v1774_v48 = vpop.eup %1773  ;;  %1793 = vrcp.f32 %v2766_v9  ;;  %v1442_v14 = vmul.f32 %v1772_v59, %v1362_v25  ;;  %v1327_v7 = vadd.f32 %v1298_v26, %v2532_v3 }
 0x2a0   :  { %v1776_v40 = vpop.eup %1775  ;;  %1503 = vst.msk [vmem:[%s2892_s4 + $0x8] sm:$0xff] %vm1501_vm4, %v1486_v45  ;;  %v1302_v50 = vmul.f32 0.6931472, %v1774_v48  ;;  %1795 = vlog2.f32 %v1284_v56  ;;  %v1290_v15 = vpop.xlane.xlu1 %1289  ;;  %v1333_v18 = vadd.f32 %v1310_v27, %v3065_v41  ;;  %v1448_v48 = vmul.f32 %v2794_v12, %v2786_v43 }
 0x2a1   :  { %v1778_v61 = vpop.eup %1777  ;;  %v1471_v52 = vsub.f32 %v1442_v14, %v1327_v7  ;;  %v1300_v22 = vmul.f32 0.6931472, %v1776_v40  ;;  %1797 = vlog2.f32 %v1290_v15  ;;  %v1288_v30 = vpop.xlane.xlu0 %1287 }
 0x2a2   :  { %v1780_v46 = vpop.eup %1779  ;;  %1799 = vrcp.f32 %v2774_v16  ;;  %v1446_v3 = vmul.f32 %v1778_v61, %v2784_v24  ;;  %v1329_v9 = vadd.f32 %v1302_v50, %v2544_v21 }
 0x2a3   :  { %v1782_v25 = vpop.eup %1781  ;;  %1801 = vrcp.f32 %v2770_v51  ;;  %v1487_v54 = vmul.f32 -1.0, %v1471_v52  ;;  %v1328_v23 = vadd.f32 %v1300_v22, %v2534_v49  ;;  %v1314_v2 = vmul.f32 0.6931472, %v1780_v46 }
 0x2a4   :  { %v1784_v58 = vpop.eup %1783  ;;  %1803 = vrcp.f32 %v2778_v17  ;;  %v1473_v29 = vsub.f32 %v1446_v3, %v1329_v9  ;;  %v1374_v57 = vpop.xlane.xlu1 %1373 }
 0x2a5   :  { %v1786_v16 = vpop.eup %1785  ;;  %1504 = vst.msk [vmem:[%s2892_s4 + $0x10] sm:$0xff] %vm1501_vm4, %v1487_v54  ;;  %v1472_v21 = vsub.f32 %v1444_v33, %v1328_v23  ;;  %1805 = vlog2.f32 %v1288_v30  ;;  %v1454_v51 = vmul.f32 %v1782_v25, %v1374_v57  ;;  %v1276_v28 = vpop.xlane.xlu0 %1275  ;;  %v1335_v35 = vadd.f32 %v1314_v2, %v2536_v53 }
 0x2a6   :  { %v1788_v24 = vpop.eup %1787  ;;  %v1489_v49 = vmul.f32 -1.0, %v1473_v29  ;;  %1807 = vlog2.f32 %v1276_v28  ;;  %v1318_v1 = vmul.f32 0.6931472, %v1786_v16 }
 0x2a7   :  { %v1790_v10 = vpop.eup %1789  ;;  %1809 = vrcp.f32 %v2772_v6  ;;  %v1488_v17 = vmul.f32 -1.0, %v1472_v21  ;;  %v1477_v4 = vsub.f32 %v1454_v51, %v1333_v18  ;;  %v1312_v5 = vmul.f32 0.6931472, %v1788_v24 }
 0x2a8   :  { %v1792_v56 = vpop.eup %1791  ;;  %1811 = vrcp.f32 %v2768_v8  ;;  %1506 = vst.msk [vmem:[%s2892_s4 + $0x20] sm:$0xff] %vm1501_vm4, %v1489_v49  ;;  %v1306_v42 = vmul.f32 0.6931472, %v1790_v10  ;;  %v1378_v32 = vpop.xlane.xlu1 %1377  ;;  %v1337_v40 = vadd.f32 %v1318_v1, %v2557_v63 }
 0x2a9   :  { %v1794_v55 = vpop.eup %1793  ;;  %1505 = vst.msk [vmem:[%s2892_s4 + $0x18] sm:$0xff] %vm1501_vm4, %v1488_v17  ;;  %v1304_v6 = vmul.f32 0.6931472, %v1792_v56  ;;  %v1493_v60 = vmul.f32 -1.0, %v1477_v4  ;;  %v1458_v11 = vmul.f32 %v1784_v58, %v1378_v32  ;;  %v1292_v8 = vpop.xlane.xlu0 %1291  ;;  %v1334_v22 = vadd.f32 %v1312_v5, %v2530_v39 }
 0x2aa   :  { %v1796_v0 = vpop.eup %1795  ;;  %v1450_v26 = vmul.f32 %v1794_v55, %v2788_v47  ;;  %v1331_v59 = vadd.f32 %v1306_v42, %v2570_v19  ;;  %1813 = vlog2.f32 %v1292_v8 }
 0x2ab   :  { %v1798_v45 = vpop.eup %1797  ;;  %1815 = vrcp.f32 %v2776_v36  ;;  %v1330_v14 = vadd.f32 %v1304_v6, %v2552_v20  ;;  %1510 = vst.msk [vmem:[%s2892_s4 + $0x40] sm:$0xff] %vm1501_vm4, %v1493_v60  ;;  %v1479_v53 = vsub.f32 %v1458_v11, %v1335_v35  ;;  %v1316_v12 = vmul.f32 0.6931472, %v1796_v0 }
 0x2ac   :  { %v1800_v7 = vpop.eup %1799  ;;  %v1475_v47 = vsub.f32 %v1450_v26, %v1331_v59  ;;  %v1382_v19 = vpop.xlane.xlu1 %1381  ;;  %v1322_v15 = vmul.f32 0.6931472, %v1798_v45  ;;  %1817 = vrcp.f32 %v2780_v31 }
 0x2ad   :  { %v1802_v27 = vpop.eup %1801  ;;  %v1474_v50 = vsub.f32 %v1448_v48, %v1330_v14  ;;  %v1495_v36 = vmul.f32 -1.0, %v1479_v53  ;;  %v1462_v61 = vmul.f32 %v1800_v7, %v1382_v19  ;;  %v1376_v52 = vpop.xlane.xlu0 %1375  ;;  %v1336_v16 = vadd.f32 %v1316_v12, %v2539_v37 }
 0x2ae   :  { %v1804_v43 = vpop.eup %1803  ;;  %v1491_v20 = vmul.f32 -1.0, %v1475_v47  ;;  %v1456_v30 = vmul.f32 %v1802_v27, %v1376_v52  ;;  %v1339_v23 = vadd.f32 %v1322_v15, %v2586_v62 }
 0x2af   :  { %v1806_v46 = vpop.eup %1805  ;;  %v1490_v3 = vmul.f32 -1.0, %v1474_v50  ;;  %1512 = vst.msk [vmem:[%s2892_s4 + $0x50] sm:$0xff] %vm1501_vm4, %v1495_v36  ;;  %v1481_v63 = vsub.f32 %v1462_v61, %v1337_v40 }
 0x2b0   :  { %v1808_v9 = vpop.eup %1807  ;;  %1508 = vst.msk [vmem:[%s2892_s4 + $0x30] sm:$0xff] %vm1501_vm4, %v1491_v20  ;;  %v1478_v25 = vsub.f32 %v1456_v30, %v1334_v22  ;;  %v1386_v33 = vpop.xlane.xlu1 %1385  ;;  %v1320_v18 = vmul.f32 0.6931472, %v1806_v46 }
 0x2b1   :  { %v1810_v39 = vpop.eup %1809  ;;  %1507 = vst.msk [vmem:[%s2892_s4 + $0x28] sm:$0xff] %vm1501_vm4, %v1490_v3  ;;  %v1308_v31 = vmul.f32 0.6931472, %v1808_v9  ;;  %v1497_v54 = vmul.f32 -1.0, %v1481_v63  ;;  %v1466_v58 = vmul.f32 %v1804_v43, %v1386_v33  ;;  %v1380_v29 = vpop.xlane.xlu0 %1379 }
 0x2b2   :  { %v1812_v41 = vpop.eup %1811  ;;  %v1494_v57 = vmul.f32 -1.0, %v1478_v25  ;;  %v1460_v2 = vmul.f32 %v1810_v39, %v1380_v29 }
 0x2b3   :  { %v1452_v21 = vmul.f32 %v1812_v41, %v2790_v34  ;;  %v1332_v51 = vadd.f32 %v1308_v31, %v3056_v38  ;;  %1514 = vst.msk [vmem:[%s2892_s4 + $0x60] sm:$0xff] %vm1501_vm4, %v1497_v54  ;;  %v1483_v28 = vsub.f32 %v1466_v58, %v1339_v23  ;;  %v1338_v38 = vadd.f32 %v1320_v18, %v2564_v44 }
 0x2b4   :  { %v1814_v24 = vpop.eup %1813  ;;  %1511 = vst.msk [vmem:[%s2892_s4 + $0x48] sm:$0xff] %vm1501_vm4, %v1494_v57  ;;  %v1480_v62 = vsub.f32 %v1460_v2, %v1336_v16 }
 0x2b5   :  { %v1816_v49 = vpop.eup %1815  ;;  %v1476_v37 = vsub.f32 %v1452_v21, %v1332_v51  ;;  %v1499_v10 = vmul.f32 -1.0, %v1483_v28  ;;  %v1384_v17 = vpop.xlane.xlu0 %1383  ;;  %v1324_v34 = vmul.f32 0.6931472, %v1814_v24 }
 0x2b6   :  { %v1496_v4 = vmul.f32 -1.0, %v1480_v62  ;;  %v1464_v56 = vmul.f32 %v1816_v49, %v1384_v17  ;;  %v1818_v32 = vpop.eup %1817 }
 0x2b7   :  { %v1492_v1 = vmul.f32 -1.0, %v1476_v37  ;;  %1516 = vst.msk [vmem:[%s2892_s4 + $0x70] sm:$0xff] %vm1501_vm4, %v1499_v10  ;;  %v1340_v6 = vadd.f32 %v1324_v34, %v3057_v13 }
 0x2b8   :  { %1513 = vst.msk [vmem:[%s2892_s4 + $0x58] sm:$0xff] %vm1501_vm4, %v1496_v4  ;;  %v1482_v42 = vsub.f32 %v1464_v56, %v1338_v38 }
 0x2b9   :  { %1509 = vst.msk [vmem:[%s2892_s4 + $0x38] sm:$0xff] %vm1501_vm4, %v1492_v1  ;;  %v1388_v44 = vpop.xlane.xlu0 %1387 }
 0x2ba   :  { %v1498_v55 = vmul.f32 -1.0, %v1482_v42  ;;  %v1468_v60 = vmul.f32 %v1818_v32, %v1388_v44 }
 0x2bc   :  { %1515 = vst.msk [vmem:[%s2892_s4 + $0x68] sm:$0xff] %vm1501_vm4, %v1498_v55  ;;  %v1484_v35 = vsub.f32 %v1468_v60, %v1340_v6 }
 0x2be   :  { %v1500_v11 = vmul.f32 -1.0, %v1484_v35 }
 0x2c0   :  { %1517 = vst.msk [vmem:[%s2892_s4 + $0x78] sm:$0xff] %vm1501_vm4, %v1500_v11 }
 0x2c1   :  { %1522 = vsyncpa [#allocation7], 1 }

</bundles_post_ra>
